<compile_context>
chip_gen: v6e
topology: v6e:2x2x1
jax: 0.10.0
libtpu: 0.0.40
codegen_flags: <defaults>
</compile_context>

<pallas_src>
import math

import jax
import jax.numpy as jnp
from jax.experimental import pallas as pl
from jax.experimental.pallas import tpu as pltpu

HIDDEN = 500  # matches the PyTorch module


def _swish(x):
    return x * jax.nn.sigmoid(x)


def ensemble_kernel(x_ref, w0_ref, b0_ref, w1_ref, b1_ref, w2_ref, b2_ref,
                    w3_ref, b3_ref, maxlv_ref, minlv_ref, out_ref):
    wdt = w0_ref.dtype  # weight compute dtype (bf16), f32 accumulation below.

    x = x_ref[0].astype(wdt)                                             # (TB, Din)
    h = jnp.dot(x, w0_ref[0], preferred_element_type=jnp.float32) + b0_ref[0]
    h = _swish(h)
    h = jnp.dot(h.astype(wdt), w1_ref[0], preferred_element_type=jnp.float32) + b1_ref[0]
    h = _swish(h)
    h = jnp.dot(h.astype(wdt), w2_ref[0], preferred_element_type=jnp.float32) + b2_ref[0]
    h = _swish(h)
    # Single final matmul over the combined [mean | logvar] width (2*Dout).
    out = jnp.dot(h.astype(wdt), w3_ref[0], preferred_element_type=jnp.float32) + b3_ref[0]

    # Logvar soft clamp, applied only to the upper half via a lane mask.
    # maxlv/minlv are tiled to width 2*Dout in the wrapper (mean half unused).
    maxlv = maxlv_ref[...]
    minlv = minlv_ref[...]
    lv = maxlv - jax.nn.softplus(maxlv - out)
    lv = minlv + jax.nn.softplus(lv - minlv)
    dout = out.shape[-1] // 2
    col = jax.lax.broadcasted_iota(jnp.int32, out.shape, 1)
    out_ref[0] = jnp.where(col >= dout, lv, out)


def ensemble_forward(x, params, *, weight_dtype=jnp.bfloat16, batch_tile=256):
    """x: (E, B, D_in) float32.  Returns (mean, logvar), each (E, B, D_out)."""
    (mu, sigma, w0, b0, w1, b1, w2, b2, w3, b3, max_logvar, min_logvar) = params
    E, B, Din = x.shape
    Dout = max_logvar.shape[-1]
    Dout2 = 2 * Dout
    H = w0.shape[-1]
    Hp = pl.cdiv(H, 128) * 128  # 500 -> 512
    pad_h = Hp - H
    assert batch_tile % 8 == 0

    # ---- Fold input normalization into layer 0 (f32, one-time wrapper cost) ----
    # x_norm @ W0 + b0 == x @ (W0 / sigma) + (b0 - mu @ (W0 / sigma))
    sigma_safe = jnp.where(sigma < 1e-12, 1.0, sigma)   # mirrors get_input_stats guard
    w0f = w0 / sigma_safe.reshape(1, Din, 1)
    b0f = b0 - jnp.matmul(mu, w0f)                      # (1,Din)@(E,Din,H) -> (E,1,H)

    # ---- Zero-pad hidden dim to a multiple of 128 (exact: swish(0)=0) ----
    w0p = jnp.pad(w0f, ((0, 0), (0, 0), (0, pad_h)))
    b0p = jnp.pad(b0f, ((0, 0), (0, 0), (0, pad_h)))
    w1p = jnp.pad(w1, ((0, 0), (0, pad_h), (0, pad_h)))
    b1p = jnp.pad(b1, ((0, 0), (0, 0), (0, pad_h)))
    w2p = jnp.pad(w2, ((0, 0), (0, pad_h), (0, pad_h)))
    b2p = jnp.pad(b2, ((0, 0), (0, 0), (0, pad_h)))
    w3p = jnp.pad(w3, ((0, 0), (0, pad_h), (0, 0)))

    # ---- bf16 weights (halve HBM->VMEM traffic); biases stay f32 ----
    w0p, w1p, w2p, w3p = (w.astype(weight_dtype) for w in (w0p, w1p, w2p, w3p))

    # Clamp bounds tiled across [mean | logvar] width so the kernel needs no concat.
    maxlv2 = jnp.tile(max_logvar, (1, 2)).astype(jnp.float32)
    minlv2 = jnp.tile(min_logvar, (1, 2)).astype(jnp.float32)

    # ---- Batch tiling: weights stay resident across the inner batch axis ----
    B8 = ((B + 7) // 8) * 8
    if B8 <= batch_tile:
        TB, B_pad = B8, B8
    else:
        TB = batch_tile
        B_pad = ((B + TB - 1) // TB) * TB
    nb = B_pad // TB
    if B_pad != B:
        x = jnp.pad(x, ((0, 0), (0, B_pad - B), (0, 0)))

    def member_spec(shape):
        ndim = len(shape)
        return pl.BlockSpec((1,) + tuple(shape[1:]),
                            lambda e, b: (e,) + (0,) * (ndim - 1))

    def shared_spec(shape):
        ndim = len(shape)
        return pl.BlockSpec(tuple(shape), lambda e, b: (0,) * ndim)

    in_specs = [
        pl.BlockSpec((1, TB, Din), lambda e, b: (e, b, 0)),   # x
        member_spec(w0p.shape), member_spec(b0p.shape),
        member_spec(w1p.shape), member_spec(b1p.shape),
        member_spec(w2p.shape), member_spec(b2p.shape),
        member_spec(w3p.shape), member_spec(b3.shape),
        shared_spec(maxlv2.shape), shared_spec(minlv2.shape),
    ]
    out_specs = pl.BlockSpec((1, TB, Dout2), lambda e, b: (e, b, 0))
    out_shape = jax.ShapeDtypeStruct((E, B_pad, Dout2), jnp.float32)

    out = pl.pallas_call(
        ensemble_kernel,
        grid_spec=pltpu.PrefetchScalarGridSpec(
            num_scalar_prefetch=0,
            grid=(E, nb),
            in_specs=in_specs,
            out_specs=out_specs,
        ),
        out_shape=out_shape,
        compiler_params=pltpu.CompilerParams(
            dimension_semantics=("parallel", "parallel"),
            vmem_limit_bytes=32 * 1024 * 1024,   # fits v7x (64 MiB physical VMEM)
        ),
    )(x, w0p, b0p, w1p, b1p, w2p, b2p, w3p, b3, maxlv2, minlv2)

    out = out[:, :B, :]
    return out[:, :, :Dout], out[:, :, Dout:]


def init_params(key, ensemble_size, input_size, output_size):
    """Deterministic synthetic init mirroring the PyTorch module's __init__."""
    def get_w_b(key, e, din, dout):
        std = 1.0 / (2.0 * math.sqrt(din))
        w = jax.random.truncated_normal(key, -2.0, 2.0, (e, din, dout),
                                        dtype=jnp.float32) * std
        b = jnp.zeros((e, 1, dout), dtype=jnp.float32)
        return w, b

    k0, k1, k2, k3 = jax.random.split(key, 4)
    w0, b0 = get_w_b(k0, ensemble_size, input_size, HIDDEN)
    w1, b1 = get_w_b(k1, ensemble_size, HIDDEN, HIDDEN)
    w2, b2 = get_w_b(k2, ensemble_size, HIDDEN, HIDDEN)
    w3, b3 = get_w_b(k3, ensemble_size, HIDDEN, 2 * output_size)

    # inputs_mu / inputs_sigma default to zeros in __init__; emulate
    # get_input_stats having set identity stats (sigma guard also in wrapper).
    mu = jnp.zeros((1, input_size), dtype=jnp.float32)
    sigma = jnp.ones((1, input_size), dtype=jnp.float32)
    max_logvar = jnp.ones((1, output_size), dtype=jnp.float32) / 2.0
    min_logvar = -jnp.ones((1, output_size), dtype=jnp.float32) * 10.0
    return (mu, sigma, w0, b0, w1, b1, w2, b2, w3, b3, max_logvar, min_logvar)


def reference_forward(x, params, weight_dtype=jnp.float32):
    """Pure-JAX reference replicating the PyTorch forward.
    weight_dtype=bf16 gives a precision-matched reference for the kernel."""
    (mu, sigma, w0, b0, w1, b1, w2, b2, w3, b3, max_logvar, min_logvar) = params
    h = (x - mu) / sigma

    def mm(a, w):
        return jnp.einsum("ebi,eio->ebo", a.astype(weight_dtype),
                          w.astype(weight_dtype),
                          preferred_element_type=jnp.float32)

    h = _swish(mm(h, w0) + b0)
    h = _swish(mm(h, w1) + b1)
    h = _swish(mm(h, w2) + b2)
    out = mm(h, w3) + b3
    Dout = max_logvar.shape[-1]
    mean = out[:, :, :Dout]
    lv = out[:, :, Dout:]
    lv = max_logvar - jax.nn.softplus(max_logvar - lv)
    lv = min_logvar + jax.nn.softplus(lv - min_logvar)
    return mean, lv


if __name__ == "__main__":
    ensemble_size = 2
    input_size = 16
    output_size = 4
    batch = 8

    key = jax.random.PRNGKey(0)
    kp, kx = jax.random.split(key)
    params = init_params(kp, ensemble_size, input_size, output_size)
    x = jax.random.normal(kx, (ensemble_size, batch, input_size), dtype=jnp.float32)

    mean, logvar = ensemble_forward(x, params)
    mean = jax.block_until_ready(mean)
    logvar = jax.block_until_ready(logvar)

    # Tight check vs a precision-matched (bf16-weight, f32-accumulate) reference:
    # validates all Pallas plumbing (tiling, padding, fold, clamp, slicing).
    mean_m, logvar_m = reference_forward(x, params, weight_dtype=jnp.bfloat16)
    assert jnp.allclose(mean, mean_m, atol=5e-4, rtol=1e-3)
    assert jnp.allclose(logvar, logvar_m, atol=5e-4, rtol=1e-3)

    # Loose sanity check vs full-f32 module semantics (slack covers bf16
    # weight quantization, which is the only intentional numerical change).
    mean_f, logvar_f = reference_forward(x, params)
    assert jnp.allclose(mean, mean_f, atol=5e-2, rtol=5e-2)
    assert jnp.allclose(logvar, logvar_f, atol=5e-2, rtol=5e-2)

    print("KERNEL_OK")
</pallas_src>

<mosaic_0001>
module attributes {stable_mosaic.version = 11 : i64} {
  func.func @ensemble_kernel(%arg0: i32, %arg1: i32, %arg2: memref<1x8x16xf32, #tpu.memory_space<vmem>>, %arg3: memref<1x16x512xbf16, #tpu.memory_space<vmem>>, %arg4: memref<1x1x512xf32, #tpu.memory_space<vmem>>, %arg5: memref<1x512x512xbf16, #tpu.memory_space<vmem>>, %arg6: memref<1x1x512xf32, #tpu.memory_space<vmem>>, %arg7: memref<1x512x512xbf16, #tpu.memory_space<vmem>>, %arg8: memref<1x1x512xf32, #tpu.memory_space<vmem>>, %arg9: memref<1x512x8xbf16, #tpu.memory_space<vmem>>, %arg10: memref<1x1x8xf32, #tpu.memory_space<vmem>>, %arg11: memref<1x8xf32, #tpu.memory_space<vmem>>, %arg12: memref<1x8xf32, #tpu.memory_space<vmem>>, %arg13: memref<1x8x8xf32, #tpu.memory_space<vmem>>) attributes {dimension_semantics = [#tpu.dimension_semantics<parallel>, #tpu.dimension_semantics<parallel>], iteration_bounds = array<i64: 2, 1>, scalar_prefetch = 0 : i64, scratch_operands = 0 : i64, tpu.core_type = #tpu.core_type<tc>, window_params = [{transform_indices = @transform_0, window_bounds = array<i64: 1, 8, 16>}, {transform_indices = @transform_1, window_bounds = array<i64: 1, 16, 512>}, {transform_indices = @transform_2, window_bounds = array<i64: 1, 1, 512>}, {transform_indices = @transform_3, window_bounds = array<i64: 1, 512, 512>}, {transform_indices = @transform_4, window_bounds = array<i64: 1, 1, 512>}, {transform_indices = @transform_5, window_bounds = array<i64: 1, 512, 512>}, {transform_indices = @transform_6, window_bounds = array<i64: 1, 1, 512>}, {transform_indices = @transform_7, window_bounds = array<i64: 1, 512, 8>}, {transform_indices = @transform_8, window_bounds = array<i64: 1, 1, 8>}, {pipeline_mode = #tpu.pipeline_mode<synchronous>, transform_indices = @transform_9, window_bounds = array<i64: 1, 8>}, {pipeline_mode = #tpu.pipeline_mode<synchronous>, transform_indices = @transform_10, window_bounds = array<i64: 1, 8>}, {transform_indices = @transform_11, window_bounds = array<i64: 1, 8, 8>}]} {
    %c0 = arith.constant 0 : index
    %c0_0 = arith.constant 0 : index
    %c0_1 = arith.constant 0 : index
    %0 = vector.load %arg2[%c0, %c0_0, %c0_1] : memref<1x8x16xf32, #tpu.memory_space<vmem>>, vector<1x8x16xf32>
    %1 = vector.shape_cast %0 : vector<1x8x16xf32> to vector<8x16xf32>
    %2 = arith.truncf %1 : vector<8x16xf32> to vector<8x16xbf16>
    %c0_2 = arith.constant 0 : index
    %c0_3 = arith.constant 0 : index
    %c0_4 = arith.constant 0 : index
    %3 = vector.load %arg3[%c0_2, %c0_3, %c0_4] : memref<1x16x512xbf16, #tpu.memory_space<vmem>>, vector<1x16x512xbf16>
    %4 = vector.shape_cast %3 : vector<1x16x512xbf16> to vector<16x512xbf16>
    %cst = arith.constant dense<0.000000e+00> : vector<8x512xf32>
    %5 = tpu.matmul %2, %4, %cst {dimension_numbers = #tpu.dot_dimension_numbers<[1], [0], [0], [1], [0, 0, 1, 1], [], []>} : vector<8x16xbf16>, vector<16x512xbf16>, vector<8x512xf32> -> vector<8x512xf32>
    %c0_5 = arith.constant 0 : index
    %c0_6 = arith.constant 0 : index
    %c0_7 = arith.constant 0 : index
    %6 = vector.load %arg4[%c0_5, %c0_6, %c0_7] : memref<1x1x512xf32, #tpu.memory_space<vmem>>, vector<1x1x512xf32>
    %7 = vector.shape_cast %6 : vector<1x1x512xf32> to vector<1x512xf32>
    %8 = vector.broadcast %7 : vector<1x512xf32> to vector<8x512xf32>
    %9 = arith.addf %5, %8 : vector<8x512xf32>
    %10 = arith.negf %9 : vector<8x512xf32>
    %11 = math.exp %10 : vector<8x512xf32>
    %cst_8 = arith.constant 1.000000e+00 : f32
    %12 = vector.broadcast %cst_8 : f32 to vector<8x512xf32>
    %13 = arith.addf %12, %11 : vector<8x512xf32>
    %14 = arith.divf %12, %13 : vector<8x512xf32>
    %15 = arith.mulf %9, %14 : vector<8x512xf32>
    %16 = arith.truncf %15 : vector<8x512xf32> to vector<8x512xbf16>
    %c0_9 = arith.constant 0 : index
    %c0_10 = arith.constant 0 : index
    %c0_11 = arith.constant 0 : index
    %17 = vector.load %arg5[%c0_9, %c0_10, %c0_11] : memref<1x512x512xbf16, #tpu.memory_space<vmem>>, vector<1x512x512xbf16>
    %18 = vector.shape_cast %17 : vector<1x512x512xbf16> to vector<512x512xbf16>
    %cst_12 = arith.constant dense<0.000000e+00> : vector<8x512xf32>
    %19 = tpu.matmul %16, %18, %cst_12 {dimension_numbers = #tpu.dot_dimension_numbers<[1], [0], [0], [1], [0, 0, 1, 1], [], []>} : vector<8x512xbf16>, vector<512x512xbf16>, vector<8x512xf32> -> vector<8x512xf32>
    %c0_13 = arith.constant 0 : index
    %c0_14 = arith.constant 0 : index
    %c0_15 = arith.constant 0 : index
    %20 = vector.load %arg6[%c0_13, %c0_14, %c0_15] : memref<1x1x512xf32, #tpu.memory_space<vmem>>, vector<1x1x512xf32>
    %21 = vector.shape_cast %20 : vector<1x1x512xf32> to vector<1x512xf32>
    %22 = vector.broadcast %21 : vector<1x512xf32> to vector<8x512xf32>
    %23 = arith.addf %19, %22 : vector<8x512xf32>
    %24 = arith.negf %23 : vector<8x512xf32>
    %25 = math.exp %24 : vector<8x512xf32>
    %cst_16 = arith.constant 1.000000e+00 : f32
    %26 = vector.broadcast %cst_16 : f32 to vector<8x512xf32>
    %27 = arith.addf %26, %25 : vector<8x512xf32>
    %28 = arith.divf %26, %27 : vector<8x512xf32>
    %29 = arith.mulf %23, %28 : vector<8x512xf32>
    %30 = arith.truncf %29 : vector<8x512xf32> to vector<8x512xbf16>
    %c0_17 = arith.constant 0 : index
    %c0_18 = arith.constant 0 : index
    %c0_19 = arith.constant 0 : index
    %31 = vector.load %arg7[%c0_17, %c0_18, %c0_19] : memref<1x512x512xbf16, #tpu.memory_space<vmem>>, vector<1x512x512xbf16>
    %32 = vector.shape_cast %31 : vector<1x512x512xbf16> to vector<512x512xbf16>
    %cst_20 = arith.constant dense<0.000000e+00> : vector<8x512xf32>
    %33 = tpu.matmul %30, %32, %cst_20 {dimension_numbers = #tpu.dot_dimension_numbers<[1], [0], [0], [1], [0, 0, 1, 1], [], []>} : vector<8x512xbf16>, vector<512x512xbf16>, vector<8x512xf32> -> vector<8x512xf32>
    %c0_21 = arith.constant 0 : index
    %c0_22 = arith.constant 0 : index
    %c0_23 = arith.constant 0 : index
    %34 = vector.load %arg8[%c0_21, %c0_22, %c0_23] : memref<1x1x512xf32, #tpu.memory_space<vmem>>, vector<1x1x512xf32>
    %35 = vector.shape_cast %34 : vector<1x1x512xf32> to vector<1x512xf32>
    %36 = vector.broadcast %35 : vector<1x512xf32> to vector<8x512xf32>
    %37 = arith.addf %33, %36 : vector<8x512xf32>
    %38 = arith.negf %37 : vector<8x512xf32>
    %39 = math.exp %38 : vector<8x512xf32>
    %cst_24 = arith.constant 1.000000e+00 : f32
    %40 = vector.broadcast %cst_24 : f32 to vector<8x512xf32>
    %41 = arith.addf %40, %39 : vector<8x512xf32>
    %42 = arith.divf %40, %41 : vector<8x512xf32>
    %43 = arith.mulf %37, %42 : vector<8x512xf32>
    %44 = arith.truncf %43 : vector<8x512xf32> to vector<8x512xbf16>
    %c0_25 = arith.constant 0 : index
    %c0_26 = arith.constant 0 : index
    %c0_27 = arith.constant 0 : index
    %45 = vector.load %arg9[%c0_25, %c0_26, %c0_27] : memref<1x512x8xbf16, #tpu.memory_space<vmem>>, vector<1x512x8xbf16>
    %46 = vector.shape_cast %45 : vector<1x512x8xbf16> to vector<512x8xbf16>
    %cst_28 = arith.constant dense<0.000000e+00> : vector<8x8xf32>
    %47 = tpu.matmul %44, %46, %cst_28 {dimension_numbers = #tpu.dot_dimension_numbers<[1], [0], [0], [1], [0, 0, 1, 1], [], []>} : vector<8x512xbf16>, vector<512x8xbf16>, vector<8x8xf32> -> vector<8x8xf32>
    %c0_29 = arith.constant 0 : index
    %c0_30 = arith.constant 0 : index
    %c0_31 = arith.constant 0 : index
    %48 = vector.load %arg10[%c0_29, %c0_30, %c0_31] : memref<1x1x8xf32, #tpu.memory_space<vmem>>, vector<1x1x8xf32>
    %49 = vector.shape_cast %48 : vector<1x1x8xf32> to vector<1x8xf32>
    %50 = vector.broadcast %49 : vector<1x8xf32> to vector<8x8xf32>
    %51 = arith.addf %47, %50 : vector<8x8xf32>
    %c0_32 = arith.constant 0 : index
    %c0_33 = arith.constant 0 : index
    %52 = vector.load %arg11[%c0_32, %c0_33] : memref<1x8xf32, #tpu.memory_space<vmem>>, vector<1x8xf32>
    %c0_34 = arith.constant 0 : index
    %c0_35 = arith.constant 0 : index
    %53 = vector.load %arg12[%c0_34, %c0_35] : memref<1x8xf32, #tpu.memory_space<vmem>>, vector<1x8xf32>
    %54 = vector.broadcast %52 : vector<1x8xf32> to vector<8x8xf32>
    %55 = arith.subf %54, %51 : vector<8x8xf32>
    %cst_36 = arith.constant 0.000000e+00 : f32
    %56 = vector.broadcast %cst_36 : f32 to vector<8x8xf32>
    %57 = arith.maximumf %55, %56 : vector<8x8xf32>
    %58 = vector.broadcast %cst_36 : f32 to vector<8x8xf32>
    %59 = arith.subf %55, %58 : vector<8x8xf32>
    %60 = arith.cmpf one, %59, %59 : vector<8x8xf32>
    %61 = vector.broadcast %cst_36 : f32 to vector<8x8xf32>
    %62 = arith.addf %55, %61 : vector<8x8xf32>
    %63 = math.absf %59 : vector<8x8xf32>
    %cst_37 = arith.constant 0.000000e+00 : f32
    %64 = vector.broadcast %cst_37 : f32 to vector<8x8xf32>
    %65 = arith.subf %64, %63 : vector<8x8xf32>
    %66 = math.exp %65 : vector<8x8xf32>
    %67 = math.log1p %66 : vector<8x8xf32>
    %68 = arith.addf %57, %67 : vector<8x8xf32>
    %69 = arith.select %60, %62, %68 : vector<8x8xi1>, vector<8x8xf32>
    %70 = vector.broadcast %52 : vector<1x8xf32> to vector<8x8xf32>
    %71 = arith.subf %70, %69 : vector<8x8xf32>
    %72 = vector.broadcast %53 : vector<1x8xf32> to vector<8x8xf32>
    %73 = arith.subf %71, %72 : vector<8x8xf32>
    %cst_38 = arith.constant 0.000000e+00 : f32
    %74 = vector.broadcast %cst_38 : f32 to vector<8x8xf32>
    %75 = arith.maximumf %73, %74 : vector<8x8xf32>
    %76 = vector.broadcast %cst_38 : f32 to vector<8x8xf32>
    %77 = arith.subf %73, %76 : vector<8x8xf32>
    %78 = arith.cmpf one, %77, %77 : vector<8x8xf32>
    %79 = vector.broadcast %cst_38 : f32 to vector<8x8xf32>
    %80 = arith.addf %73, %79 : vector<8x8xf32>
    %81 = math.absf %77 : vector<8x8xf32>
    %cst_39 = arith.constant 0.000000e+00 : f32
    %82 = vector.broadcast %cst_39 : f32 to vector<8x8xf32>
    %83 = arith.subf %82, %81 : vector<8x8xf32>
    %84 = math.exp %83 : vector<8x8xf32>
    %85 = math.log1p %84 : vector<8x8xf32>
    %86 = arith.addf %75, %85 : vector<8x8xf32>
    %87 = arith.select %78, %80, %86 : vector<8x8xi1>, vector<8x8xf32>
    %88 = vector.broadcast %53 : vector<1x8xf32> to vector<8x8xf32>
    %89 = arith.addf %88, %87 : vector<8x8xf32>
    %90 = tpu.iota {dimensions = array<i32: 1>} : vector<8x8xi32>
    %c4_i32 = arith.constant 4 : i32
    %91 = vector.broadcast %c4_i32 : i32 to vector<8x8xi32>
    %92 = arith.cmpi sge, %90, %91 : vector<8x8xi32>
    %93 = arith.select %92, %89, %51 : vector<8x8xi1>, vector<8x8xf32>
    %c0_40 = arith.constant 0 : index
    %c0_41 = arith.constant 0 : index
    %c0_42 = arith.constant 0 : index
    %94 = vector.load %arg13[%c0_40, %c0_41, %c0_42] : memref<1x8x8xf32, #tpu.memory_space<vmem>>, vector<1x8x8xf32>
    %95 = vector.shape_cast %94 : vector<1x8x8xf32> to vector<8x8xf32>
    %96 = vector.shape_cast %93 : vector<8x8xf32> to vector<1x8x8xf32>
    tpu.vector_store %arg13[%c0_40, %c0_41, %c0_42], %96 {strides = array<i32>} : memref<1x8x8xf32, #tpu.memory_space<vmem>>, vector<1x8x8xf32>,
    return
  }
  func.func @transform_0(%arg0: i32, %arg1: i32) -> (i32, i32, i32) {
    %c0_i32 = arith.constant 0 : i32
    %c0_i32_0 = arith.constant 0 : i32
    return %arg0, %arg1, %c0_i32 : i32, i32, i32
  }
  func.func @transform_1(%arg0: i32, %arg1: i32) -> (i32, i32, i32) {
    %c0_i32 = arith.constant 0 : i32
    %c0_i32_0 = arith.constant 0 : i32
    %c0_i32_1 = arith.constant 0 : i32
    return %arg0, %c0_i32, %c0_i32_0 : i32, i32, i32
  }
  func.func @transform_2(%arg0: i32, %arg1: i32) -> (i32, i32, i32) {
    %c0_i32 = arith.constant 0 : i32
    %c0_i32_0 = arith.constant 0 : i32
    %c0_i32_1 = arith.constant 0 : i32
    return %arg0, %c0_i32, %c0_i32_0 : i32, i32, i32
  }
  func.func @transform_3(%arg0: i32, %arg1: i32) -> (i32, i32, i32) {
    %c0_i32 = arith.constant 0 : i32
    %c0_i32_0 = arith.constant 0 : i32
    %c0_i32_1 = arith.constant 0 : i32
    return %arg0, %c0_i32, %c0_i32_0 : i32, i32, i32
  }
  func.func @transform_4(%arg0: i32, %arg1: i32) -> (i32, i32, i32) {
    %c0_i32 = arith.constant 0 : i32
    %c0_i32_0 = arith.constant 0 : i32
    %c0_i32_1 = arith.constant 0 : i32
    return %arg0, %c0_i32, %c0_i32_0 : i32, i32, i32
  }
  func.func @transform_5(%arg0: i32, %arg1: i32) -> (i32, i32, i32) {
    %c0_i32 = arith.constant 0 : i32
    %c0_i32_0 = arith.constant 0 : i32
    %c0_i32_1 = arith.constant 0 : i32
    return %arg0, %c0_i32, %c0_i32_0 : i32, i32, i32
  }
  func.func @transform_6(%arg0: i32, %arg1: i32) -> (i32, i32, i32) {
    %c0_i32 = arith.constant 0 : i32
    %c0_i32_0 = arith.constant 0 : i32
    %c0_i32_1 = arith.constant 0 : i32
    return %arg0, %c0_i32, %c0_i32_0 : i32, i32, i32
  }
  func.func @transform_7(%arg0: i32, %arg1: i32) -> (i32, i32, i32) {
    %c0_i32 = arith.constant 0 : i32
    %c0_i32_0 = arith.constant 0 : i32
    %c0_i32_1 = arith.constant 0 : i32
    return %arg0, %c0_i32, %c0_i32_0 : i32, i32, i32
  }
  func.func @transform_8(%arg0: i32, %arg1: i32) -> (i32, i32, i32) {
    %c0_i32 = arith.constant 0 : i32
    %c0_i32_0 = arith.constant 0 : i32
    %c0_i32_1 = arith.constant 0 : i32
    return %arg0, %c0_i32, %c0_i32_0 : i32, i32, i32
  }
  func.func @transform_9(%arg0: i32, %arg1: i32) -> (i32, i32) {
    %c0_i32 = arith.constant 0 : i32
    %c0_i32_0 = arith.constant 0 : i32
    %c0_i32_1 = arith.constant 0 : i32
    return %c0_i32, %c0_i32_0 : i32, i32
  }
  func.func @transform_10(%arg0: i32, %arg1: i32) -> (i32, i32) {
    %c0_i32 = arith.constant 0 : i32
    %c0_i32_0 = arith.constant 0 : i32
    %c0_i32_1 = arith.constant 0 : i32
    return %c0_i32, %c0_i32_0 : i32, i32
  }
  func.func @transform_11(%arg0: i32, %arg1: i32) -> (i32, i32, i32) {
    %c0_i32 = arith.constant 0 : i32
    %c0_i32_0 = arith.constant 0 : i32
    return %arg0, %arg1, %c0_i32 : i32, i32, i32
  }
}

</mosaic_0001>

<bundles_post_ra>
// kernel: tpu_custom_call.1
= control target key start
LH: loop header
LB: loop body
LE: loop exit
PB: predicated region body
PF: predicated region fallthrough
CT: control target
= control target key end

     0   :  { %s5027_s0 = inlined_call_operand.vmem [shape: f32[2,8,16], index: 0, kind: input, shape index: {}]   ;;  %s5028_s1 = inlined_call_operand.vmem [shape: bf16[2,16,512], index: 1, kind: input, shape index: {}]   ;;  %s5029_s2 = inlined_call_operand.vmem [shape: f32[2,1,512], index: 2, kind: input, shape index: {}]   ;;  %s5030_s3 = inlined_call_operand.hbm [shape: bf16[2,512,512], index: 3, kind: input, shape index: {}]   ;;  %s5031_s4 = inlined_call_operand.vmem [shape: f32[2,1,512], index: 4, kind: input, shape index: {}]   ;;  %s5032_s5 = inlined_call_operand.hbm [shape: bf16[2,512,512], index: 5, kind: input, shape index: {}]   ;;  %s5033_s6 = inlined_call_operand.vmem [shape: f32[2,1,512], index: 6, kind: input, shape index: {}]   ;;  %s5034_s7 = inlined_call_operand.vmem [shape: bf16[2,512,8], index: 7, kind: input, shape index: {}]   ;;  %s5035_s8 = inlined_call_operand.vmem [shape: f32[2,1,8], index: 8, kind: input, shape index: {}]   ;;  %s5036_s9 = inlined_call_operand.vmem [shape: f32[1,8], index: 9, kind: input, shape index: {}]   ;;  %s5037_s10 = inlined_call_operand.vmem [shape: f32[1,8], index: 10, kind: input, shape index: {}]   ;;  %s5038_s11 = inlined_call_operand.hbm [shape: f32[2,8,8], index: 11, kind: output, shape index: {}]  }
   0x1   :  { %5047 = sst [smem:[#allocation17_spill]] %s5030_s3 }
   0x2   :  { %5048 = sst [smem:[#allocation18_spill]] %s5037_s10 }
   0x3   :  { %5049 = sst [smem:[#allocation19_spill]] %s5038_s11 }
   0x4   :  { %16 = vsyncpa [#allocation3], 0 }
   0x5   :  { %18 = vsyncpa [#allocation3 + $0x1], 0 }
   0x6   :  { %19 = vsyncpa [#allocation6], 0 }
   0x7   :  { %21 = vsyncpa [#allocation6 + $0x1], 0 }
   0x8   :  { %22 = vsyncpa [#allocation4], 0 }
   0x9   :  { %24 = vsyncpa [#allocation4 + $0x1], 0  ;;  %s4474_s17 = smov 0   ;;  %s4476_s18 = smov 0  }
   0xa   :  { %s4478_s19 = smov 0   ;;  %s4480_s20 = smov 0  }
   0xb   :  { %s4482_s21 = smov 0   ;;  %s4484_s22 = smov 0  }
   0xc LB: > { %5050 = sst [smem:[#allocation11_spill]] %s4386_s17  ;;  %s3335_s23 = sadd.s32 4294967295, %s4406_s22   ;;  %s4406_s22 = sphi %s4484_s22, %s30_s22   ;;  %s4402_s21 = sphi %s4482_s21, %s5075_s21   ;;  %s4398_s20 = sphi %s4480_s20, %s5074_s20   ;;  %s4394_s19 = sphi %s4478_s19, %s5070_s19   ;;  %s4390_s18 = sphi %s4476_s18, %s5073_s18   ;;  %s4386_s17 = sphi %s4474_s17, %s5072_s17  }
   0xd   : > { %5051 = sst [smem:[#allocation12_spill]] %s4394_s19  ;;  %s3336_s24 = sadd.s32 4294967294, %s4406_s22  }
   0xe   : > { %s42_s25 = sadd.s32 1, %s4402_s21  ;;  %s129_s26 = sadd.s32 1, %s4394_s19 }
   0xf   : > { %p44_p0 = scmp.ge.s32.totalorder %s42_s25, 2  ;;  %p136_p1 = scmp.ne.s32.totalorder %s4394_s19, %s4390_s18 }
  0x10   : > { %p137_p2 = scmp.eq.s32.totalorder %s4406_s22, 0  ;;  %p142_p3 = scmp.ne.s32.totalorder %s4390_s18, %s4386_s17 }
  0x11   : > { %s5077_s25 = smov (%p44_p0, %s42_s25), 0  ;;  %p143_p5 = scmp.eq.s32.totalorder %s3335_s23, 0 }
  0x12   : > { %5052 = sst [smem:[#allocation13_spill]] %s5077_s25  ;;  %p4515_p4 = por %p137_p2, %p136_p1 }
  0x13   : > { %s126_s28 = ssub.s32 %s4402_s21, %s5077_s25  ;;  %p340_p6 = scmp.eq.s32.totalorder %s3335_s23, 1 }
  0x14   : > { %p127_p7 = scmp.eq.s32.totalorder %s126_s28, 0  ;;  %p4521_p8 = por %p143_p5, %p142_p3 }
  0x15   : > { %p4525_p9 = por %p340_p6, %p136_p1  ;;  %p346_p10 = scmp.eq.s32.totalorder %s3336_s24, 1 }
  0x16   : > { %s4530_s12 = scalar_select %p127_p7, %s4394_s19, %s129_s26  }
  0x17   : > { %s5055_s30 = scalar_select %p4525_p9, 1, 0 }
  0x18   : > { %5057 = sst [smem:[#allocation15_spill]] %s4530_s12  ;;  %p4532_p11 = por %p346_p10, %p142_p3 }
  0x19   : > { %5056 = sst [smem:[#allocation14_spill]] %s5055_s30  ;;  %p3338_p12 = scmp.ge.s32.totalorder %s4406_s22, 2 }
  0x1a   : > { %s5058_s13 = scalar_select %p4532_p11, 1, 0 }
  0x1b   : > { %p3735_p13 = scmp.lt.s32.totalorder %s4406_s22, 2  ;;  %s4539_s14 = sand.u32 1, %s4394_s19  }
  0x1c   : > { %5059 = sst [smem:[#allocation16_spill]] %s5058_s13  ;;  %s5042_s15 = sshll.u32 %s4539_s14, 10 }
  0x1d   : > { %s3670_s16 = sshll.u32 %s4402_s21, 14  ;;  %s5060_s3 = sld [smem:[#allocation17_spill]] }
  0x1e   : > { %s401_s26 = scalar_lea.vmem [#allocation2], %s5042_s15  ;;  %p4552_p0 = pnand %p3735_p13, %p4515_p4 }
  0x1f   : > { %s408_s25 = sshll.u32 %s401_s26, 4  ;;  %p3345_p1 = scmp.ge.s32.totalorder %s4406_s22, 1  ;;  %s409_s25 = int_to_ptr.vmem [resolvable:$true] %s408_s25 }
  0x20   : > { %s398_s19 = scalar_lea.sflag [#allocation3], %s4539_s14  ;;  %p4268_p2 = pneg %p4552_p0 }
  0x21   : > { %s4279_s13 = scalar_lea.vmem %s409_s25, 16384  ;;  %s4408_s23 = smov [#allocation2]  }
  0x22   : > { %p4280_p3 = scmp.ne.s32.totalorder %s409_s25, %s4279_s13  ;;  %s4284_s28 = sshll.u32 %s4408_s23, 4  ;;  %s4285_s28 = int_to_ptr.vmem [resolvable:$false] %s4284_s28 }
  0x23   : > { %s407_s24 = scalar_lea.hbm %s5060_s3, %s3670_s16  ;;  %s4286_s27 = scalar_lea.vmem %s4285_s28, 32768 }
  0x24   : > { %p4282_p5 = pnand %p4280_p3, %p4268_p2  ;;  %p4287_p4 = scmp.lt.s32.totalorder %s409_s25, %s4285_s28 }
  0x25   : > { %p4288_p7 = scmp.lt.s32.totalorder %s4286_s27, %s4279_s13 }
  0x26   : > { %p4283_p6 = pneg %p4282_p5 }
  0x27   : > { %p4289_p10 = por %p4288_p7, %p4287_p4 }
  0x29   : > { %p4290_p13 = pnand %p4289_p10, %p4283_p6 }
  0x2b   : > { %4293 = shalt.err (!%p4290_p13)
}
  0x2c   : > { %s4409_s26 = smov 256   ;;  %s4410_s15 = smov 16  }
  0x2d   : > { %3727 = dma.hbm_to_vmem [thread:$0]  (!%p4552_p0), %s407_s24, 16384, %s409_s25, %s398_s19, %s4409_s26, %s4409_s26, %s4410_s15  }
  0x2e   : > { %p465_p3 = scmp.lt.s32.totalorder %s4406_s22, 3  ;;  %s435_s13 = scalar_lea.hbm %s5032_s5, %s3670_s16 }
  0x2f   : > { %s5063_s27 = sshll.u32 %s4539_s14, 10  ;;  %s426_s30 = scalar_lea.sflag [#allocation6], %s4539_s14 }
  0x30   : > { %p4573_p5 = pnand %p3345_p1, %p465_p3  ;;  %s429_s17 = scalar_lea.vmem [#allocation5], %s5063_s27 }
  0x31   : > { %s436_s11 = sshll.u32 %s429_s17, 4  ;;  %s4411_s19 = smov [#allocation5]   ;;  %s437_s11 = int_to_ptr.vmem [resolvable:$true] %s436_s11 }
  0x32   : > { %s4307_s10 = scalar_lea.vmem %s437_s11, 16384  ;;  %s4312_s25 = sshll.u32 %s4411_s19, 4  ;;  %s4313_s25 = int_to_ptr.vmem [resolvable:$false] %s4312_s25 }
  0x33   : > { %p4308_p6 = scmp.ne.s32.totalorder %s437_s11, %s4307_s10  ;;  %s4314_s3 = scalar_lea.vmem %s4313_s25, 32768 }
  0x34   : > { %p4315_p10 = scmp.lt.s32.totalorder %s437_s11, %s4313_s25  ;;  %p4316_p1 = scmp.lt.s32.totalorder %s4314_s3, %s4307_s10 }
  0x35   : > { %p4310_p4 = pnand %p4308_p6, %p4268_p2 }
  0x36   : > { %p4317_p13 = por %p4316_p1, %p4315_p10 }
  0x37   : > { %p4311_p7 = pneg %p4310_p4 }
  0x39   : > { %p4318_p3 = pnand %p4317_p13, %p4311_p7 }
  0x3b   : > { %4321 = shalt.err (!%p4318_p3)
}
  0x3c   : > { %3730 = dma.hbm_to_vmem [thread:$0]  (!%p4552_p0), %s435_s13, 16384, %s437_s11, %s426_s30, %s4409_s26, %s4409_s26, %s4410_s15  }
  0x3d   : > { %469 = sbr.rel (%p4573_p5) target bundleno = 1217 (0x4c1), region = 64  ;;  %s4588_s17 = sand.u32 (!%p4573_p5), 1, %s4390_s18  }
  0x3e   : > { %s3346_s14 = sshll.u32 (!%p4573_p5), %s4588_s17, 10  ;;  %s472_s16 = scalar_lea.sflag (!%p4573_p5), [#allocation3], %s4588_s17 }
  0x3f   : > { %s4592_s24 = scalar_lea.vmem (!%p4573_p5), [#allocation2], %s3346_s14 }
  0x42   : > { %4373 = dma.done.wait (%p4521_p8), %s472_s16, 16384  }
  0x43   : > { %4375 = vsyncadd (%p4521_p8), %s472_s16, 4294950912  ;;  %s481_s10 = scalar_lea.sflag [#allocation6], %s4588_s17  ;;  %s4599_s11 = scalar_lea.vmem [#allocation5], %s3346_s14 }
  0x44   : > { %4377 = dma.done.wait (%p4521_p8), %s481_s10, 16384  }
  0x45   : > { %4379 = vsyncadd (%p4521_p8), %s481_s10, 4294950912  ;;  %p560_p0 = scmp.lt.s32.totalorder %s4398_s20, 1  ;;  %v4412_v0 = vmov 0   ;;  %v3794_v7 = vld [vmem:[%s4592_s24 + $0xe0] ss:$16 sps:$4 sm:$0xff]   ;;  %vm641_vm0 = vcmask 130048  }
  0x46   : > { %677 = vmatprep.mubr.bf16.mxu0 %v4412_v0  ;;  %718 = vmatprep.mubr.bf16.mxu1 %v4412_v0  ;;  %v3796_v8 = vld [vmem:[%s4592_s24 + $0xe4] ss:$16 sps:$4 sm:$0xff]   ;;  %v3797_v9 = vld [vmem:[%s4592_s24 + $0x2e0] ss:$16 sps:$4 sm:$0xff]   ;;  %s3348_s10 = sshll.u32 %s4588_s17, 3  ;;  %vm3132_vm6 = vcmask 64512  }
  0x47   : > { %s4607_s30 = scalar_select %p560_p0, %s4398_s20, 1  ;;  %v3799_v10 = vld [vmem:[%s4592_s24 + $0x2e4] ss:$16 sps:$4 sm:$0xff]   ;;  %v3800_v12 = vld [vmem:[%s4592_s24 + $0xc0] ss:$16 sps:$4 sm:$0xff]  }
  0x48   : > { %v3802_v11 = vld [vmem:[%s4592_s24 + $0xc4] ss:$16 sps:$4 sm:$0xff]   ;;  %v3803_v14 = vld [vmem:[%s4592_s24 + $0x2c0] ss:$16 sps:$4 sm:$0xff]   ;;  %s3135_s28 = scalar_lea.sflag [#allocation4], %s4588_s17 }
  0x49   : > { %s3672_s12 = sshll.u32 %s4607_s30, 5  ;;  %s3349_s29 = sshll.u32 %s4607_s30, 3  ;;  %v3805_v13 = vld [vmem:[%s4592_s24 + $0x2c4] ss:$16 sps:$4 sm:$0xff]   ;;  %v3806_v17 = vld [vmem:[%s4592_s24 + $0xa0] ss:$16 sps:$4 sm:$0xff]  }
  0x4a   : > { %s571_s23 = scalar_lea.vmem %s5028_s1, %s3672_s12  ;;  %s566_s27 = scalar_lea.vmem %s5027_s0, %s3349_s29  ;;  %v3808_v15 = vld [vmem:[%s4592_s24 + $0xa4] ss:$16 sps:$4 sm:$0xff]   ;;  %v3809_v18 = vld [vmem:[%s4592_s24 + $0x2a0] ss:$16 sps:$4 sm:$0xff]  }
  0x4b   : > { %v3788_v1 = vld [vmem:[%s571_s23 + $0x4] ss:$16 sps:$4 sm:$0xff]   ;;  %v3790_v2 = vld [vmem:[%s571_s23 + $0xc] ss:$16 sps:$4 sm:$0xff]   ;;  %v3792_v3 = vld [vmem:[%s571_s23] ss:$16 sps:$4 sm:$0xff]  }
  0x4c   : > { %659 = vmatprep.subr.bf16.mxu0 %v3788_v1  ;;  %v3793_v4 = vld [vmem:[%s571_s23 + $0x8] ss:$16 sps:$4 sm:$0xff]   ;;  %v593_v5 = vld [vmem:[%s566_s27] sm:$0xff]  ;;  %700 = vmatprep.subr.bf16.mxu1 %v3790_v2  ;;  %s3673_s19 = sshll.u32 %s4607_s30, 8  ;;  %s4690_s16 = sshll.u32 %s4607_s30, 2 }
  0x4d   : > { %v594_v6 = vpack.c.bf16 %v593_v5, %v593_v5  ;;  %660 = vmatpush1.bf16.msra.mxu0 %v3792_v3  ;;  %701 = vmatpush1.bf16.msra.mxu1 %v3793_v4  ;;  %v3811_v16 = vld [vmem:[%s4592_s24 + $0x2a4] ss:$16 sps:$4 sm:$0xff]   ;;  %v3812_v21 = vld [vmem:[%s4592_s24 + $0x80] ss:$16 sps:$4 sm:$0xff]   ;;  %s4685_s14 = scalar_lea.vmem %s5034_s7, %s3673_s19  ;;  %s575_s15 = scalar_lea.vmem %s5029_s2, %s4690_s16 }
  0x4e   : > { %1549 = vmatprep.subr.bf16.mxu0 %v3796_v8  ;;  %1590 = vmatprep.subr.bf16.mxu1 %v3799_v10  ;;  %v3814_v19 = vld [vmem:[%s4592_s24 + $0x84] ss:$16 sps:$4 sm:$0xff]   ;;  %v3815_v22 = vld [vmem:[%s4592_s24 + $0x280] ss:$16 sps:$4 sm:$0xff]   ;;  %v3895_v8 = vld [vmem:[%s4592_s24 + $0x2ec] ss:$16 sps:$4 sm:$0xff]   ;;  %s579_s23 = scalar_lea.vmem %s5031_s4, %s4690_s16  ;;  %s583_s13 = scalar_lea.vmem %s5033_s6, %s4690_s16 }
  0x4f   : > { %v3817_v20 = vld [vmem:[%s4592_s24 + $0x284] ss:$16 sps:$4 sm:$0xff]   ;;  %v3818_v24 = vld [vmem:[%s4592_s24 + $0x60] ss:$16 sps:$4 sm:$0xff]   ;;  %s591_s19 = scalar_lea.vmem %s5035_s8, %s4607_s30  ;;  %s5064_s16 = sld [smem:[#allocation18_spill]] }
  0x50   : > { %3361 = vmatmul.mubr.msk.bf16.vlgmr.msra.gmra.mxu0 %vm641_vm0, %v594_v6  ;;  %3362 = vmatmul.mubr.msk.bf16.vlgmr.msra.gmra.mxu1 %vm641_vm0, %v594_v6  ;;  %v3820_v23 = vld [vmem:[%s4592_s24 + $0x64] ss:$16 sps:$4 sm:$0xff]   ;;  %v3821_v26 = vld [vmem:[%s4592_s24 + $0x260] ss:$16 sps:$4 sm:$0xff]   ;;  %s5066_s29 = sld [smem:[#allocation19_spill]] }
  0x51   : > { %1550 = vmatpush1.bf16.msra.mxu0 %v3794_v7  ;;  %1591 = vmatpush1.bf16.msra.mxu1 %v3797_v9  ;;  %v3823_v25 = vld [vmem:[%s4592_s24 + $0x264] ss:$16 sps:$4 sm:$0xff]   ;;  %v3824_v29 = vld [vmem:[%s4592_s24 + $0x40] ss:$16 sps:$4 sm:$0xff]   ;;  %v3892_v7 = vld [vmem:[%s4592_s24 + $0xec] ss:$16 sps:$4 sm:$0xff]   ;;  %v601_v9 = vlaneseq }
  0x52   : > { %1551 = vmatprep.subr.bf16.mxu0 %v3802_v11  ;;  %1592 = vmatprep.subr.bf16.mxu1 %v3805_v13  ;;  %v3826_v27 = vld [vmem:[%s4592_s24 + $0x44] ss:$16 sps:$4 sm:$0xff]   ;;  %v3827_v30 = vld [vmem:[%s4592_s24 + $0x240] ss:$16 sps:$4 sm:$0xff]  }
  0x53   : > { %v3829_v28 = vld [vmem:[%s4592_s24 + $0x244] ss:$16 sps:$4 sm:$0xff]   ;;  %v3830_v33 = vld [vmem:[%s4592_s24 + $0x20] ss:$16 sps:$4 sm:$0xff]   ;;  %v602_v10 = vshrl.u32 %v601_v9, 7 }
  0x54   : > { %v3832_v31 = vld [vmem:[%s4592_s24 + $0x24] ss:$16 sps:$4 sm:$0xff]   ;;  %v3833_v34 = vld [vmem:[%s4592_s24 + $0x220] ss:$16 sps:$4 sm:$0xff]  }
  0x55   : > { %1552 = vmatpush1.bf16.msra.mxu0 %v3800_v12  ;;  %1593 = vmatpush1.bf16.msra.mxu1 %v3803_v14  ;;  %v3835_v32 = vld [vmem:[%s4592_s24 + $0x224] ss:$16 sps:$4 sm:$0xff]   ;;  %v3836_v37 = vld [vmem:[%s4592_s24] ss:$16 sps:$4 sm:$0xff]   ;;  %v4697_v11 = vsub.s32 0, %v602_v10  ;;  %v4699_v12 = vsub.s32 2, %v602_v10 }
  0x56   : > { %1553 = vmatprep.subr.bf16.mxu0 %v3808_v15  ;;  %1594 = vmatprep.subr.bf16.mxu1 %v3811_v16  ;;  %v3838_v35 = vld [vmem:[%s4592_s24 + $0x4] ss:$16 sps:$4 sm:$0xff]   ;;  %v3839_v38 = vld [vmem:[%s4592_s24 + $0x200] ss:$16 sps:$4 sm:$0xff]   ;;  %v4701_v14 = vsub.s32 1, %v602_v10  ;;  %v4703_v15 = vsub.s32 3, %v602_v10 }
  0x57   : > { %v3841_v36 = vld [vmem:[%s4592_s24 + $0x204] ss:$16 sps:$4 sm:$0xff]   ;;  %v3842_v41 = vld [vmem:[%s4592_s24 + $0x1e0] ss:$16 sps:$4 sm:$0xff]   ;;  %v3917_v10 = vld [vmem:[%s4592_s24 + $0x268] ss:$16 sps:$4 sm:$0xff]  }
  0x58   : > { %v3844_v39 = vld [vmem:[%s4592_s24 + $0x1e4] ss:$16 sps:$4 sm:$0xff]   ;;  %v3845_v42 = vld [vmem:[%s4592_s24 + $0x3e0] ss:$16 sps:$4 sm:$0xff]  }
  0x59   : > { %1554 = vmatpush1.bf16.msra.mxu0 %v3806_v17  ;;  %1595 = vmatpush1.bf16.msra.mxu1 %v3809_v18  ;;  %v3847_v40 = vld [vmem:[%s4592_s24 + $0x3e4] ss:$16 sps:$4 sm:$0xff]   ;;  %v3848_v45 = vld [vmem:[%s4592_s24 + $0x1c0] ss:$16 sps:$4 sm:$0xff]  }
  0x5a   : > { %1555 = vmatprep.subr.bf16.mxu0 %v3814_v19  ;;  %1596 = vmatprep.subr.bf16.mxu1 %v3817_v20  ;;  %v3850_v43 = vld [vmem:[%s4592_s24 + $0x1c4] ss:$16 sps:$4 sm:$0xff]   ;;  %v3851_v46 = vld [vmem:[%s4592_s24 + $0x3c0] ss:$16 sps:$4 sm:$0xff]  }
  0x5b   : > { %v3853_v44 = vld [vmem:[%s4592_s24 + $0x3c4] ss:$16 sps:$4 sm:$0xff]   ;;  %v3854_v49 = vld [vmem:[%s4592_s24 + $0x1a0] ss:$16 sps:$4 sm:$0xff]  }
  0x5c   : > { %v3856_v47 = vld [vmem:[%s4592_s24 + $0x1a4] ss:$16 sps:$4 sm:$0xff]   ;;  %v3857_v50 = vld [vmem:[%s4592_s24 + $0x3a0] ss:$16 sps:$4 sm:$0xff]  }
  0x5d   : > { %1556 = vmatpush1.bf16.msra.mxu0 %v3812_v21  ;;  %1597 = vmatpush1.bf16.msra.mxu1 %v3815_v22  ;;  %v3859_v48 = vld [vmem:[%s4592_s24 + $0x3a4] ss:$16 sps:$4 sm:$0xff]   ;;  %v3860_v53 = vld [vmem:[%s4592_s24 + $0x180] ss:$16 sps:$4 sm:$0xff]  }
  0x5e   : > { %1557 = vmatprep.subr.bf16.mxu0 %v3820_v23  ;;  %1598 = vmatprep.subr.bf16.mxu1 %v3823_v25  ;;  %v3862_v51 = vld [vmem:[%s4592_s24 + $0x184] ss:$16 sps:$4 sm:$0xff]   ;;  %v3863_v54 = vld [vmem:[%s4592_s24 + $0x380] ss:$16 sps:$4 sm:$0xff]  }
  0x5f   : > { %v3865_v52 = vld [vmem:[%s4592_s24 + $0x384] ss:$16 sps:$4 sm:$0xff]   ;;  %v3866_v57 = vld [vmem:[%s4592_s24 + $0x160] ss:$16 sps:$4 sm:$0xff]  }
  0x60   : > { %v3868_v55 = vld [vmem:[%s4592_s24 + $0x164] ss:$16 sps:$4 sm:$0xff]   ;;  %v3869_v58 = vld [vmem:[%s4592_s24 + $0x360] ss:$16 sps:$4 sm:$0xff]  }
  0x61   : > { %1558 = vmatpush1.bf16.msra.mxu0 %v3818_v24  ;;  %1599 = vmatpush1.bf16.msra.mxu1 %v3821_v26  ;;  %v3871_v56 = vld [vmem:[%s4592_s24 + $0x364] ss:$16 sps:$4 sm:$0xff]   ;;  %v3872_v61 = vld [vmem:[%s4592_s24 + $0x140] ss:$16 sps:$4 sm:$0xff]  }
  0x62   : > { %1559 = vmatprep.subr.bf16.mxu0 %v3826_v27  ;;  %1600 = vmatprep.subr.bf16.mxu1 %v3829_v28  ;;  %v3874_v59 = vld [vmem:[%s4592_s24 + $0x144] ss:$16 sps:$4 sm:$0xff]   ;;  %v3875_v62 = vld [vmem:[%s4592_s24 + $0x340] ss:$16 sps:$4 sm:$0xff]  }
  0x63   : > { %v3877_v60 = vld [vmem:[%s4592_s24 + $0x344] ss:$16 sps:$4 sm:$0xff]   ;;  %v3878_v1 = vld [vmem:[%s4592_s24 + $0x120] ss:$16 sps:$4 sm:$0xff]  }
  0x64   : > { %v3880_v63 = vld [vmem:[%s4592_s24 + $0x124] ss:$16 sps:$4 sm:$0xff]   ;;  %v3881_v2 = vld [vmem:[%s4592_s24 + $0x320] ss:$16 sps:$4 sm:$0xff]  }
  0x65   : > { %1560 = vmatpush1.bf16.msra.mxu0 %v3824_v29  ;;  %1601 = vmatpush1.bf16.msra.mxu1 %v3827_v30  ;;  %v3883_v0 = vld [vmem:[%s4592_s24 + $0x324] ss:$16 sps:$4 sm:$0xff]   ;;  %v3884_v5 = vld [vmem:[%s4592_s24 + $0x100] ss:$16 sps:$4 sm:$0xff]  }
  0x66   : > { %1561 = vmatprep.subr.bf16.mxu0 %v3832_v31  ;;  %1602 = vmatprep.subr.bf16.mxu1 %v3835_v32  ;;  %v3886_v3 = vld [vmem:[%s4592_s24 + $0x104] ss:$16 sps:$4 sm:$0xff]   ;;  %v3887_v6 = vld [vmem:[%s4592_s24 + $0x300] ss:$16 sps:$4 sm:$0xff]  }
  0x67   : > { %v3889_v4 = vld [vmem:[%s4592_s24 + $0x304] ss:$16 sps:$4 sm:$0xff]   ;;  %v599_v13 = vld [vmem:[%s575_s15] sm:$0xf]  ;;  %s3667_s15 = sshll.u32 %s4398_s20, 7  ;;  %s4413_s20 = smov [#allocation7]  }
  0x68   : > { %v604_v16 = vrot.slane %v599_v13, %v4697_v11  ;;  %v612_v17 = vrot.slane %v599_v13, %v4699_v12  ;;  %v608_v18 = vrot.slane %v599_v13, %v4701_v14  ;;  %v616_v19 = vrot.slane %v599_v13, %v4703_v15  ;;  %v3922_v13 = vld [vmem:[%s4592_s24 + $0x4c] ss:$16 sps:$4 sm:$0xff]  }
  0x69   : > { %1562 = vmatpush1.bf16.msra.mxu0 %v3830_v33  ;;  %1603 = vmatpush1.bf16.msra.mxu1 %v3833_v34 }
  0x6a   : > { %1563 = vmatprep.subr.bf16.mxu0 %v3838_v35  ;;  %1604 = vmatprep.subr.bf16.mxu1 %v3841_v36 }
  0x6d   : > { %1564 = vmatpush1.bf16.msra.mxu0 %v3836_v37  ;;  %1605 = vmatpush1.bf16.msra.mxu1 %v3839_v38 }
  0x6e   : > { %1565 = vmatprep.subr.bf16.mxu0 %v3844_v39  ;;  %1606 = vmatprep.subr.bf16.mxu1 %v3847_v40 }
  0x71   : > { %1566 = vmatpush2.bf16.msra.mxu0 %v3842_v41  ;;  %1607 = vmatpush2.bf16.msra.mxu1 %v3845_v42 }
  0x72   : > { %1567 = vmatprep.subr.bf16.mxu0 %v3850_v43  ;;  %1608 = vmatprep.subr.bf16.mxu1 %v3853_v44 }
  0x75   : > { %1568 = vmatpush2.bf16.msra.mxu0 %v3848_v45  ;;  %1609 = vmatpush2.bf16.msra.mxu1 %v3851_v46 }
  0x76   : > { %1569 = vmatprep.subr.bf16.mxu0 %v3856_v47  ;;  %1610 = vmatprep.subr.bf16.mxu1 %v3859_v48 }
  0x79   : > { %1570 = vmatpush2.bf16.msra.mxu0 %v3854_v49  ;;  %1611 = vmatpush2.bf16.msra.mxu1 %v3857_v50 }
  0x7a   : > { %1571 = vmatprep.subr.bf16.mxu0 %v3862_v51  ;;  %1612 = vmatprep.subr.bf16.mxu1 %v3865_v52 }
  0x7d   : > { %1572 = vmatpush2.bf16.msra.mxu0 %v3860_v53  ;;  %1613 = vmatpush2.bf16.msra.mxu1 %v3863_v54  ;;  %v3890_v53 = vld [vmem:[%s4592_s24 + $0xe8] ss:$16 sps:$4 sm:$0xff]  }
  0x7e   : > { %1573 = vmatprep.subr.bf16.mxu0 %v3868_v55  ;;  %1614 = vmatprep.subr.bf16.mxu1 %v3871_v56  ;;  %v3893_v56 = vld [vmem:[%s4592_s24 + $0x2e8] ss:$16 sps:$4 sm:$0xff]  }
  0x81   : > { %1574 = vmatpush2.bf16.msra.mxu0 %v3866_v57  ;;  %1615 = vmatpush2.bf16.msra.mxu1 %v3869_v58  ;;  %v3898_v58 = vld [vmem:[%s4592_s24 + $0xcc] ss:$16 sps:$4 sm:$0xff]  }
  0x82   : > { %1575 = vmatprep.subr.bf16.mxu0 %v3874_v59  ;;  %1616 = vmatprep.subr.bf16.mxu1 %v3877_v60  ;;  %v3901_v59 = vld [vmem:[%s4592_s24 + $0x2cc] ss:$16 sps:$4 sm:$0xff]   ;;  %v3896_v60 = vld [vmem:[%s4592_s24 + $0xc8] ss:$16 sps:$4 sm:$0xff]  }
  0x85   : > { %1576 = vmatpush2.bf16.msra.mxu0 %v3872_v61  ;;  %1617 = vmatpush2.bf16.msra.mxu1 %v3875_v62  ;;  %v3899_v61 = vld [vmem:[%s4592_s24 + $0x2c8] ss:$16 sps:$4 sm:$0xff]   ;;  %v3904_v62 = vld [vmem:[%s4592_s24 + $0xac] ss:$16 sps:$4 sm:$0xff]  }
  0x86   : > { %1577 = vmatprep.subr.bf16.mxu0 %v3880_v63  ;;  %1618 = vmatprep.subr.bf16.mxu1 %v3883_v0  ;;  %v3907_v63 = vld [vmem:[%s4592_s24 + $0x2ac] ss:$16 sps:$4 sm:$0xff]   ;;  %v3902_v0 = vld [vmem:[%s4592_s24 + $0xa8] ss:$16 sps:$4 sm:$0xff]  }
  0x89   : > { %1578 = vmatpush2.bf16.msra.mxu0 %v3878_v1  ;;  %1619 = vmatpush2.bf16.msra.mxu1 %v3881_v2  ;;  %v3905_v1 = vld [vmem:[%s4592_s24 + $0x2a8] ss:$16 sps:$4 sm:$0xff]   ;;  %v3910_v2 = vld [vmem:[%s4592_s24 + $0x8c] ss:$16 sps:$4 sm:$0xff]  }
  0x8a   : > { %1579 = vmatprep.subr.bf16.mxu0 %v3886_v3  ;;  %1620 = vmatprep.subr.bf16.mxu1 %v3889_v4  ;;  %v3913_v3 = vld [vmem:[%s4592_s24 + $0x28c] ss:$16 sps:$4 sm:$0xff]   ;;  %v3908_v4 = vld [vmem:[%s4592_s24 + $0x88] ss:$16 sps:$4 sm:$0xff]  }
  0x8d   : > { %1580 = vmatpush2.bf16.msra.mxu0 %v3884_v5  ;;  %1621 = vmatpush2.bf16.msra.mxu1 %v3887_v6  ;;  %v3911_v5 = vld [vmem:[%s4592_s24 + $0x288] ss:$16 sps:$4 sm:$0xff]   ;;  %v3916_v6 = vld [vmem:[%s4592_s24 + $0x6c] ss:$16 sps:$4 sm:$0xff]  }
  0x8e   : > { %1631 = vmatprep.subr.bf16.mxu0 %v3892_v7  ;;  %1672 = vmatprep.subr.bf16.mxu1 %v3895_v8  ;;  %v3919_v7 = vld [vmem:[%s4592_s24 + $0x26c] ss:$16 sps:$4 sm:$0xff]   ;;  %v3914_v8 = vld [vmem:[%s4592_s24 + $0x68] ss:$16 sps:$4 sm:$0xff]  }
 0x110   : > { %v679_v20 = vpop.f32.mrf.mxu0  ;;  %v720_v21 = vpop.f32.mrf.mxu1 }
 0x111   : > { %v680_v22 = vadd.f32 %v679_v20, %v604_v16  ;;  %v721_v23 = vadd.f32 %v720_v21, %v612_v17  ;;  %v3925_v16 = vld [vmem:[%s4592_s24 + $0x24c] ss:$16 sps:$4 sm:$0xff]   ;;  %v3920_v17 = vld [vmem:[%s4592_s24 + $0x48] ss:$16 sps:$4 sm:$0xff]  }
 0x112   : > { %v681_v24 = vpop.f32.mrf.mxu0  ;;  %v722_v25 = vpop.f32.mrf.mxu1  ;;  %v3931_v20 = vld [vmem:[%s4592_s24 + $0x22c] ss:$16 sps:$4 sm:$0xff]   ;;  %v3926_v21 = vld [vmem:[%s4592_s24 + $0x28] ss:$16 sps:$4 sm:$0xff]  }
 0x113   : > { %v3363_v26 = vmul.f32 -1.442695, %v680_v22  ;;  %v3365_v27 = vmul.f32 -1.442695, %v721_v23  ;;  %v682_v28 = vadd.f32 %v681_v24, %v608_v18  ;;  %v723_v29 = vadd.f32 %v722_v25, %v616_v19  ;;  %v3923_v18 = vld [vmem:[%s4592_s24 + $0x248] ss:$16 sps:$4 sm:$0xff]  }
 0x114   : > { %v683_v30 = vpop.f32.mrf.mxu0  ;;  %v724_v31 = vpop.f32.mrf.mxu1  ;;  %v3928_v19 = vld [vmem:[%s4592_s24 + $0x2c] ss:$16 sps:$4 sm:$0xff]   ;;  %v3932_v25 = vld [vmem:[%s4592_s24 + $0x8] ss:$16 sps:$4 sm:$0xff]  }
 0x115   : > { %4210 = vpow2.f32 %v3363_v26  ;;  %v3364_v32 = vmul.f32 -1.442695, %v682_v28  ;;  %v3366_v33 = vmul.f32 -1.442695, %v723_v29  ;;  %v3937_v24 = vld [vmem:[%s4592_s24 + $0x20c] ss:$16 sps:$4 sm:$0xff]  }
 0x116   : > { %4212 = vpow2.f32 %v3365_v27  ;;  %v684_v34 = vpop.f32.mrf.mxu0  ;;  %v725_v35 = vpop.f32.mrf.mxu1  ;;  %v3935_v26 = vld [vmem:[%s4592_s24 + $0x208] ss:$16 sps:$4 sm:$0xff]   ;;  %v3940_v27 = vld [vmem:[%s4592_s24 + $0x1ec] ss:$16 sps:$4 sm:$0xff]  }
 0x117   : > { %4214 = vpow2.f32 %v3364_v32  ;;  %v3941_v30 = vld [vmem:[%s4592_s24 + $0x3e8] ss:$16 sps:$4 sm:$0xff]   ;;  %v3946_v31 = vld [vmem:[%s4592_s24 + $0x1cc] ss:$16 sps:$4 sm:$0xff]  }
 0x118   : > { %4216 = vpow2.f32 %v3366_v33  ;;  %v3949_v32 = vld [vmem:[%s4592_s24 + $0x3cc] ss:$16 sps:$4 sm:$0xff]   ;;  %v3944_v33 = vld [vmem:[%s4592_s24 + $0x1c8] ss:$16 sps:$4 sm:$0xff]  }
 0x119   : > { %v3947_v34 = vld [vmem:[%s4592_s24 + $0x3c8] ss:$16 sps:$4 sm:$0xff]   ;;  %v3952_v35 = vld [vmem:[%s4592_s24 + $0x1ac] ss:$16 sps:$4 sm:$0xff]  }
 0x122   : > { %v4211_v36 = vpop.eup %4210 }
 0x123   : > { %v4213_v37 = vpop.eup %4212  ;;  %v739_v38 = vadd.f32 1.0, %v4211_v36  ;;  %v3955_v36 = vld [vmem:[%s4592_s24 + $0x3ac] ss:$16 sps:$4 sm:$0xff]  }
 0x124   : > { %v4215_v39 = vpop.eup %4214  ;;  %v741_v40 = vadd.f32 1.0, %v4213_v37  ;;  %v3950_v37 = vld [vmem:[%s4592_s24 + $0x1a8] ss:$16 sps:$4 sm:$0xff]  }
 0x125   : > { %v4217_v41 = vpop.eup %4216  ;;  %4218 = vrcp.f32 %v739_v38  ;;  %v740_v42 = vadd.f32 1.0, %v4215_v39  ;;  %v3953_v38 = vld [vmem:[%s4592_s24 + $0x3a8] ss:$16 sps:$4 sm:$0xff]   ;;  %v3958_v39 = vld [vmem:[%s4592_s24 + $0x18c] ss:$16 sps:$4 sm:$0xff]  }
 0x126   : > { %4220 = vrcp.f32 %v741_v40  ;;  %v742_v43 = vadd.f32 1.0, %v4217_v41  ;;  %v3961_v40 = vld [vmem:[%s4592_s24 + $0x38c] ss:$16 sps:$4 sm:$0xff]   ;;  %v3956_v41 = vld [vmem:[%s4592_s24 + $0x188] ss:$16 sps:$4 sm:$0xff]  }
 0x127   : > { %4222 = vrcp.f32 %v740_v42  ;;  %v3959_v42 = vld [vmem:[%s4592_s24 + $0x388] ss:$16 sps:$4 sm:$0xff]  }
 0x128   : > { %4224 = vrcp.f32 %v742_v43  ;;  %v3964_v43 = vld [vmem:[%s4592_s24 + $0x16c] ss:$16 sps:$4 sm:$0xff]  }
 0x132   : > { %v4219_v44 = vpop.eup %4218 }
 0x133   : > { %v4221_v45 = vpop.eup %4220  ;;  %v751_v47 = vmul.f32 %v4219_v44, %v680_v22  ;;  %v3929_v22 = vld [vmem:[%s4592_s24 + $0x228] ss:$16 sps:$4 sm:$0xff]   ;;  %v3967_v44 = vld [vmem:[%s4592_s24 + $0x36c] ss:$16 sps:$4 sm:$0xff]  }
 0x134   : > { %v4223_v46 = vpop.eup %4222  ;;  %v753_v49 = vmul.f32 %v4221_v45, %v721_v23  ;;  %v3934_v23 = vld [vmem:[%s4592_s24 + $0xc] ss:$16 sps:$4 sm:$0xff]   ;;  %v3962_v45 = vld [vmem:[%s4592_s24 + $0x168] ss:$16 sps:$4 sm:$0xff]  }
 0x135   : > { %v4225_v48 = vpop.eup %4224  ;;  %v752_v50 = vmul.f32 %v4223_v46, %v682_v28  ;;  %v4710_v54 = vpack.c.bf16 %v751_v47, %v751_v47  ;;  %v3943_v28 = vld [vmem:[%s4592_s24 + $0x3ec] ss:$16 sps:$4 sm:$0xff]   ;;  %v3965_v46 = vld [vmem:[%s4592_s24 + $0x368] ss:$16 sps:$4 sm:$0xff]  }
 0x136   : > { %v754_v51 = vmul.f32 %v4225_v48, %v723_v29  ;;  %v4713_v57 = vpack.c.bf16 %v753_v49, %v753_v49  ;;  %v3938_v29 = vld [vmem:[%s4592_s24 + $0x1e8] ss:$16 sps:$4 sm:$0xff]   ;;  %v3970_v47 = vld [vmem:[%s4592_s24 + $0x14c] ss:$16 sps:$4 sm:$0xff]  }
 0x137   : > { %v756_v52 = vpack.c.bf16 %v752_v50, %v752_v50  ;;  %v3973_v48 = vld [vmem:[%s4592_s24 + $0x34c] ss:$16 sps:$4 sm:$0xff]   ;;  %v3968_v49 = vld [vmem:[%s4592_s24 + $0x148] ss:$16 sps:$4 sm:$0xff]  }
 0x138   : > { %v758_v55 = vpack.c.bf16 %v754_v51, %v754_v51  ;;  %v3971_v50 = vld [vmem:[%s4592_s24 + $0x348] ss:$16 sps:$4 sm:$0xff]   ;;  %v3976_v51 = vld [vmem:[%s4592_s24 + $0x12c] ss:$16 sps:$4 sm:$0xff]  }
 0x139   : > { %1581 = vmatprep.mubr.bf16.mxu0 %v756_v52 }
 0x13a   : > { %1622 = vmatprep.mubr.bf16.mxu1 %v758_v55  ;;  %1582 = vmatmul.mubr.bf16.vlgmr.msra.gmra.mxu0 %v4710_v54 }
 0x13b   : > { %1623 = vmatmul.mubr.bf16.vlgmr.msra.gmra.mxu1 %v4713_v57  ;;  %1632 = vmatpush1.bf16.msra.mxu0 %v3890_v53  ;;  %v3974_v53 = vld [vmem:[%s4592_s24 + $0x128] ss:$16 sps:$4 sm:$0xff]  }
 0x13c   : > { %1673 = vmatpush1.bf16.msra.mxu1 %v3893_v56  ;;  %1663 = vmatprep.mubr.bf16.mxu0 %v756_v52  ;;  %v3979_v52 = vld [vmem:[%s4592_s24 + $0x32c] ss:$16 sps:$4 sm:$0xff]  }
 0x13d   : > { %1704 = vmatprep.mubr.bf16.mxu1 %v758_v55  ;;  %1633 = vmatprep.subr.bf16.mxu0 %v3898_v58  ;;  %v3977_v55 = vld [vmem:[%s4592_s24 + $0x328] ss:$16 sps:$4 sm:$0xff]   ;;  %v3982_v56 = vld [vmem:[%s4592_s24 + $0x10c] ss:$16 sps:$4 sm:$0xff]  }
 0x13e   : > { %1674 = vmatprep.subr.bf16.mxu1 %v3901_v59  ;;  %v3985_v58 = vld [vmem:[%s4592_s24 + $0x30c] ss:$16 sps:$4 sm:$0xff]   ;;  %v3980_v59 = vld [vmem:[%s4592_s24 + $0x108] ss:$16 sps:$4 sm:$0xff]  }
 0x13f   : > { %1634 = vmatpush1.bf16.msra.mxu0 %v3896_v60  ;;  %v3983_v60 = vld [vmem:[%s4592_s24 + $0x308] ss:$16 sps:$4 sm:$0xff]   ;;  %s559_s24 = scalar_lea.vmem [#allocation7], %s3348_s10 }
 0x140   : > { %1675 = vmatpush1.bf16.msra.mxu1 %v3899_v61  ;;  %1635 = vmatprep.subr.bf16.mxu0 %v3904_v62  ;;  %v3988_v61 = vld [vmem:[%s4599_s11 + $0xe4] ss:$16 sps:$4 sm:$0xff]   ;;  %v3986_v62 = vld [vmem:[%s4599_s11 + $0xe0] ss:$16 sps:$4 sm:$0xff]   ;;  %s3149_s26 = sshll.u32 %s559_s24, 4  ;;  %s3150_s26 = int_to_ptr.vmem [resolvable:$true] %s3149_s26 }
 0x141   : > { %1676 = vmatprep.subr.bf16.mxu1 %v3907_v63  ;;  %v3991_v63 = vld [vmem:[%s4599_s11 + $0xc4] ss:$16 sps:$4 sm:$0xff]   ;;  %s4322_s27 = scalar_lea.vmem %s3150_s26, 128 }
 0x142   : > { %p4323_p8 = scmp.ne.s32.totalorder %s3150_s26, %s4322_s27 }
 0x143   : > { %1636 = vmatpush1.bf16.msra.mxu0 %v3902_v0  ;;  %v3989_v0 = vld [vmem:[%s4599_s11 + $0xc0] ss:$16 sps:$4 sm:$0xff]  }
 0x144   : > { %1677 = vmatpush1.bf16.msra.mxu1 %v3905_v1  ;;  %1637 = vmatprep.subr.bf16.mxu0 %v3910_v2  ;;  %v3994_v1 = vld [vmem:[%s4599_s11 + $0xa4] ss:$16 sps:$4 sm:$0xff]   ;;  %v3992_v2 = vld [vmem:[%s4599_s11 + $0xa0] ss:$16 sps:$4 sm:$0xff]   ;;  %p4324_p2 = pnand %p4323_p8, %p4525_p9 }
 0x145   : > { %1678 = vmatprep.subr.bf16.mxu1 %v3913_v3  ;;  %v3997_v3 = vld [vmem:[%s4599_s11 + $0x84] ss:$16 sps:$4 sm:$0xff]  }
 0x146   : > { %p4325_p5 = pneg %p4324_p2 }
 0x147   : > { %1638 = vmatpush1.bf16.msra.mxu0 %v3908_v4  ;;  %v3995_v4 = vld [vmem:[%s4599_s11 + $0x80] ss:$16 sps:$4 sm:$0xff]  }
 0x148   : > { %1679 = vmatpush1.bf16.msra.mxu1 %v3911_v5  ;;  %1639 = vmatprep.subr.bf16.mxu0 %v3916_v6  ;;  %v4003_v5 = vld [vmem:[%s4599_s11 + $0x44] ss:$16 sps:$4 sm:$0xff]   ;;  %v4001_v6 = vld [vmem:[%s4599_s11 + $0x40] ss:$16 sps:$4 sm:$0xff]  }
 0x149   : > { %1680 = vmatprep.subr.bf16.mxu1 %v3919_v7  ;;  %v4006_v7 = vld [vmem:[%s4599_s11 + $0x24] ss:$16 sps:$4 sm:$0xff]  }
 0x14b   : > { %1640 = vmatpush1.bf16.msra.mxu0 %v3914_v8  ;;  %v4004_v8 = vld [vmem:[%s4599_s11 + $0x20] ss:$16 sps:$4 sm:$0xff]  }
 0x14c   : > { %1681 = vmatpush1.bf16.msra.mxu1 %v3917_v10  ;;  %1641 = vmatprep.subr.bf16.mxu0 %v3922_v13  ;;  %v4009_v10 = vld [vmem:[%s4599_s11 + $0x4] ss:$16 sps:$4 sm:$0xff]   ;;  %v4007_v13 = vld [vmem:[%s4599_s11] ss:$16 sps:$4 sm:$0xff]  }
 0x14d   : > { %1682 = vmatprep.subr.bf16.mxu1 %v3925_v16  ;;  %v4012_v16 = vld [vmem:[%s4599_s11 + $0x1e4] ss:$16 sps:$4 sm:$0xff]  }
 0x14f   : > { %1642 = vmatpush1.bf16.msra.mxu0 %v3920_v17  ;;  %v4010_v17 = vld [vmem:[%s4599_s11 + $0x1e0] ss:$16 sps:$4 sm:$0xff]  }
 0x150   : > { %1683 = vmatpush1.bf16.msra.mxu1 %v3923_v18  ;;  %1643 = vmatprep.subr.bf16.mxu0 %v3928_v19  ;;  %v4015_v18 = vld [vmem:[%s4599_s11 + $0x1c4] ss:$16 sps:$4 sm:$0xff]   ;;  %v4013_v19 = vld [vmem:[%s4599_s11 + $0x1c0] ss:$16 sps:$4 sm:$0xff]  }
 0x151   : > { %1684 = vmatprep.subr.bf16.mxu1 %v3931_v20  ;;  %v4018_v20 = vld [vmem:[%s4599_s11 + $0x1a4] ss:$16 sps:$4 sm:$0xff]  }
 0x153   : > { %1644 = vmatpush1.bf16.msra.mxu0 %v3926_v21  ;;  %v4016_v21 = vld [vmem:[%s4599_s11 + $0x1a0] ss:$16 sps:$4 sm:$0xff]  }
 0x154   : > { %1685 = vmatpush1.bf16.msra.mxu1 %v3929_v22  ;;  %1645 = vmatprep.subr.bf16.mxu0 %v3934_v23  ;;  %v4021_v22 = vld [vmem:[%s4599_s11 + $0x184] ss:$16 sps:$4 sm:$0xff]   ;;  %v4019_v23 = vld [vmem:[%s4599_s11 + $0x180] ss:$16 sps:$4 sm:$0xff]  }
 0x155   : > { %1686 = vmatprep.subr.bf16.mxu1 %v3937_v24  ;;  %v4034_v24 = vld [vmem:[%s4599_s11 + $0x2e0] ss:$16 sps:$4 sm:$0xff]  }
 0x157   : > { %1646 = vmatpush1.bf16.msra.mxu0 %v3932_v25  ;;  %v4036_v25 = vld [vmem:[%s4599_s11 + $0x2e4] ss:$16 sps:$4 sm:$0xff]  }
 0x158   : > { %1687 = vmatpush1.bf16.msra.mxu1 %v3935_v26  ;;  %1647 = vmatprep.subr.bf16.mxu0 %v3940_v27  ;;  %v4024_v26 = vld [vmem:[%s4599_s11 + $0x164] ss:$16 sps:$4 sm:$0xff]   ;;  %v4022_v27 = vld [vmem:[%s4599_s11 + $0x160] ss:$16 sps:$4 sm:$0xff]  }
 0x159   : > { %1688 = vmatprep.subr.bf16.mxu1 %v3943_v28  ;;  %v4040_v28 = vld [vmem:[%s4599_s11 + $0x2c0] ss:$16 sps:$4 sm:$0xff]  }
 0x15b   : > { %1648 = vmatpush2.bf16.msra.mxu0 %v3938_v29  ;;  %v4042_v29 = vld [vmem:[%s4599_s11 + $0x2c4] ss:$16 sps:$4 sm:$0xff]  }
 0x15c   : > { %1689 = vmatpush2.bf16.msra.mxu1 %v3941_v30  ;;  %1649 = vmatprep.subr.bf16.mxu0 %v3946_v31  ;;  %v4027_v30 = vld [vmem:[%s4599_s11 + $0x144] ss:$16 sps:$4 sm:$0xff]   ;;  %v4025_v31 = vld [vmem:[%s4599_s11 + $0x140] ss:$16 sps:$4 sm:$0xff]  }
 0x15d   : > { %1690 = vmatprep.subr.bf16.mxu1 %v3949_v32  ;;  %v4046_v32 = vld [vmem:[%s4599_s11 + $0x2a0] ss:$16 sps:$4 sm:$0xff]  }
 0x15f   : > { %1650 = vmatpush2.bf16.msra.mxu0 %v3944_v33  ;;  %v4048_v33 = vld [vmem:[%s4599_s11 + $0x2a4] ss:$16 sps:$4 sm:$0xff]  }
 0x160   : > { %1691 = vmatpush2.bf16.msra.mxu1 %v3947_v34  ;;  %1651 = vmatprep.subr.bf16.mxu0 %v3952_v35  ;;  %v4030_v34 = vld [vmem:[%s4599_s11 + $0x124] ss:$16 sps:$4 sm:$0xff]   ;;  %v4028_v35 = vld [vmem:[%s4599_s11 + $0x120] ss:$16 sps:$4 sm:$0xff]  }
 0x161   : > { %1692 = vmatprep.subr.bf16.mxu1 %v3955_v36  ;;  %v4052_v36 = vld [vmem:[%s4599_s11 + $0x280] ss:$16 sps:$4 sm:$0xff]  }
 0x163   : > { %1652 = vmatpush2.bf16.msra.mxu0 %v3950_v37  ;;  %v4054_v37 = vld [vmem:[%s4599_s11 + $0x284] ss:$16 sps:$4 sm:$0xff]  }
 0x164   : > { %1693 = vmatpush2.bf16.msra.mxu1 %v3953_v38  ;;  %1653 = vmatprep.subr.bf16.mxu0 %v3958_v39  ;;  %v4033_v38 = vld [vmem:[%s4599_s11 + $0x104] ss:$16 sps:$4 sm:$0xff]   ;;  %v4031_v39 = vld [vmem:[%s4599_s11 + $0x100] ss:$16 sps:$4 sm:$0xff]  }
 0x165   : > { %1694 = vmatprep.subr.bf16.mxu1 %v3961_v40  ;;  %v4058_v40 = vld [vmem:[%s4599_s11 + $0x260] ss:$16 sps:$4 sm:$0xff]  }
 0x167   : > { %1654 = vmatpush2.bf16.msra.mxu0 %v3956_v41  ;;  %v4060_v41 = vld [vmem:[%s4599_s11 + $0x264] ss:$16 sps:$4 sm:$0xff]  }
 0x168   : > { %1695 = vmatpush2.bf16.msra.mxu1 %v3959_v42  ;;  %1655 = vmatprep.subr.bf16.mxu0 %v3964_v43  ;;  %v4039_v42 = vld [vmem:[%s4599_s11 + $0xec] ss:$16 sps:$4 sm:$0xff]   ;;  %v4064_v43 = vld [vmem:[%s4599_s11 + $0x240] ss:$16 sps:$4 sm:$0xff]  }
 0x169   : > { %1696 = vmatprep.subr.bf16.mxu1 %v3967_v44  ;;  %v4066_v44 = vld [vmem:[%s4599_s11 + $0x244] ss:$16 sps:$4 sm:$0xff]  }
 0x16b   : > { %1656 = vmatpush2.bf16.msra.mxu0 %v3962_v45  ;;  %v4072_v45 = vld [vmem:[%s4599_s11 + $0x224] ss:$16 sps:$4 sm:$0xff]  }
 0x16c   : > { %1697 = vmatpush2.bf16.msra.mxu1 %v3965_v46  ;;  %1657 = vmatprep.subr.bf16.mxu0 %v3970_v47  ;;  %v4070_v46 = vld [vmem:[%s4599_s11 + $0x220] ss:$16 sps:$4 sm:$0xff]   ;;  %v4078_v47 = vld [vmem:[%s4599_s11 + $0x204] ss:$16 sps:$4 sm:$0xff]  }
 0x16d   : > { %1698 = vmatprep.subr.bf16.mxu1 %v3973_v48  ;;  %v4076_v48 = vld [vmem:[%s4599_s11 + $0x200] ss:$16 sps:$4 sm:$0xff]  }
 0x16f   : > { %1658 = vmatpush2.bf16.msra.mxu0 %v3968_v49  ;;  %v4084_v49 = vld [vmem:[%s4599_s11 + $0x3e4] ss:$16 sps:$4 sm:$0xff]  }
 0x170   : > { %1699 = vmatpush2.bf16.msra.mxu1 %v3971_v50  ;;  %1659 = vmatprep.subr.bf16.mxu0 %v3976_v51  ;;  %v4082_v50 = vld [vmem:[%s4599_s11 + $0x3e0] ss:$16 sps:$4 sm:$0xff]   ;;  %v4090_v51 = vld [vmem:[%s4599_s11 + $0x3c4] ss:$16 sps:$4 sm:$0xff]  }
 0x171   : > { %1700 = vmatprep.subr.bf16.mxu1 %v3979_v52  ;;  %v4088_v52 = vld [vmem:[%s4599_s11 + $0x3c0] ss:$16 sps:$4 sm:$0xff]  }
 0x173   : > { %1660 = vmatpush2.bf16.msra.mxu0 %v3974_v53  ;;  %v4096_v53 = vld [vmem:[%s4599_s11 + $0x3a4] ss:$16 sps:$4 sm:$0xff]  }
 0x174   : > { %1701 = vmatpush2.bf16.msra.mxu1 %v3977_v55  ;;  %1661 = vmatprep.subr.bf16.mxu0 %v3982_v56  ;;  %v4094_v55 = vld [vmem:[%s4599_s11 + $0x3a0] ss:$16 sps:$4 sm:$0xff]   ;;  %v4102_v56 = vld [vmem:[%s4599_s11 + $0x384] ss:$16 sps:$4 sm:$0xff]  }
 0x175   : > { %1702 = vmatprep.subr.bf16.mxu1 %v3985_v58  ;;  %v4100_v58 = vld [vmem:[%s4599_s11 + $0x380] ss:$16 sps:$4 sm:$0xff]  }
 0x177   : > { %1662 = vmatpush2.bf16.msra.mxu0 %v3980_v59  ;;  %v4108_v59 = vld [vmem:[%s4599_s11 + $0x364] ss:$16 sps:$4 sm:$0xff]  }
 0x178   : > { %1703 = vmatpush2.bf16.msra.mxu1 %v3983_v60  ;;  %2535 = vmatprep.subr.bf16.mxu0 %v3988_v61  ;;  %v4106_v60 = vld [vmem:[%s4599_s11 + $0x360] ss:$16 sps:$4 sm:$0xff]   ;;  %v4114_v61 = vld [vmem:[%s4599_s11 + $0x344] ss:$16 sps:$4 sm:$0xff]  }
 0x179   : > { %2576 = vmatprep.subr.bf16.mxu1 %v4036_v25 }
 0x17a   : > { %1664 = vmatmul.mubr.bf16.vlgmr.msra.gmra.mxu0 %v4710_v54  ;;  %v4000_v54 = vld [vmem:[%s4599_s11 + $0x64] ss:$16 sps:$4 sm:$0xff]  }
 0x17b   : > { %1705 = vmatmul.mubr.bf16.vlgmr.msra.gmra.mxu1 %v4713_v57  ;;  %2536 = vmatpush1.bf16.msra.mxu0 %v3986_v62  ;;  %v3998_v57 = vld [vmem:[%s4599_s11 + $0x60] ss:$16 sps:$4 sm:$0xff]  }
 0x17c   : > { %2537 = vmatprep.subr.bf16.mxu0 %v3991_v63  ;;  %2577 = vmatpush1.bf16.msra.mxu1 %v4034_v24  ;;  %v4112_v62 = vld [vmem:[%s4599_s11 + $0x340] ss:$16 sps:$4 sm:$0xff]   ;;  %v4120_v63 = vld [vmem:[%s4599_s11 + $0x324] ss:$16 sps:$4 sm:$0xff]  }
 0x17d   : > { %2578 = vmatprep.subr.bf16.mxu1 %v4042_v29 }
 0x17f   : > { %2538 = vmatpush1.bf16.msra.mxu0 %v3989_v0  ;;  %v4118_v0 = vld [vmem:[%s4599_s11 + $0x320] ss:$16 sps:$4 sm:$0xff]  }
 0x180   : > { %2539 = vmatprep.subr.bf16.mxu0 %v3994_v1  ;;  %2579 = vmatpush1.bf16.msra.mxu1 %v4040_v28  ;;  %v4126_v1 = vld [vmem:[%s4599_s11 + $0x304] ss:$16 sps:$4 sm:$0xff]  }
 0x181   : > { %2580 = vmatprep.subr.bf16.mxu1 %v4048_v33  ;;  %v4037_v33 = vld [vmem:[%s4599_s11 + $0xe8] ss:$16 sps:$4 sm:$0xff]  }
 0x183   : > { %2540 = vmatpush1.bf16.msra.mxu0 %v3992_v2  ;;  %v4124_v2 = vld [vmem:[%s4599_s11 + $0x300] ss:$16 sps:$4 sm:$0xff]  }
 0x184   : > { %2541 = vmatprep.subr.bf16.mxu0 %v3997_v3  ;;  %2581 = vmatpush1.bf16.msra.mxu1 %v4046_v32  ;;  %v4132_v3 = vld [vmem:[%s4599_s11 + $0x2ec] ss:$16 sps:$4 sm:$0xff]  }
 0x185   : > { %2582 = vmatprep.subr.bf16.mxu1 %v4054_v37  ;;  %v4051_v37 = vld [vmem:[%s4599_s11 + $0xac] ss:$16 sps:$4 sm:$0xff]  }
 0x187   : > { %2542 = vmatpush1.bf16.msra.mxu0 %v3995_v4  ;;  %v4849_v4 = vld [vmem:[%s579_s23] sm:$0xf] }
 0x188   : > { %2543 = vmatprep.subr.bf16.mxu0 %v4000_v54  ;;  %2583 = vmatpush1.bf16.msra.mxu1 %v4052_v36  ;;  %v892_v54 = vrot.slane %v4849_v4, %v4697_v11  ;;  %v4043_v36 = vld [vmem:[%s4599_s11 + $0xc8] ss:$16 sps:$4 sm:$0xff]  }
 0x189   : > { %2584 = vmatprep.subr.bf16.mxu1 %v4060_v41  ;;  %v4063_v41 = vld [vmem:[%s4599_s11 + $0x6c] ss:$16 sps:$4 sm:$0xff]  }
 0x18b   : > { %2544 = vmatpush1.bf16.msra.mxu0 %v3998_v57  ;;  %v896_v57 = vrot.slane %v4849_v4, %v4701_v14 }
 0x18c   : > { %2545 = vmatprep.subr.bf16.mxu0 %v4003_v5  ;;  %2585 = vmatpush1.bf16.msra.mxu1 %v4058_v40  ;;  %v4055_v40 = vld [vmem:[%s4599_s11 + $0x88] ss:$16 sps:$4 sm:$0xff]  }
 0x18d   : > { %2586 = vmatprep.subr.bf16.mxu1 %v4066_v44  ;;  %v900_v44 = vrot.slane %v4849_v4, %v4699_v12 }
 0x18f   : > { %2546 = vmatpush1.bf16.msra.mxu0 %v4001_v6 }
 0x190   : > { %2547 = vmatprep.subr.bf16.mxu0 %v4006_v7  ;;  %2587 = vmatpush1.bf16.msra.mxu1 %v4064_v43  ;;  %v4069_v43 = vld [vmem:[%s4599_s11 + $0x4c] ss:$16 sps:$4 sm:$0xff]  }
 0x191   : > { %2588 = vmatprep.subr.bf16.mxu1 %v4072_v45  ;;  %v4067_v45 = vld [vmem:[%s4599_s11 + $0x48] ss:$16 sps:$4 sm:$0xff]  }
 0x193   : > { %2548 = vmatpush1.bf16.msra.mxu0 %v4004_v8 }
 0x194   : > { %2549 = vmatprep.subr.bf16.mxu0 %v4009_v10  ;;  %2589 = vmatpush1.bf16.msra.mxu1 %v4070_v46  ;;  %v4075_v46 = vld [vmem:[%s4599_s11 + $0x2c] ss:$16 sps:$4 sm:$0xff]  }
 0x195   : > { %2590 = vmatprep.subr.bf16.mxu1 %v4078_v47  ;;  %v904_v47 = vrot.slane %v4849_v4, %v4703_v15  ;;  %v4085_v4 = vld [vmem:[%s4599_s11 + $0x1e8] ss:$16 sps:$4 sm:$0xff]  }
 0x197   : > { %2550 = vmatpush1.bf16.msra.mxu0 %v4007_v13 }
 0x198   : > { %2551 = vmatprep.subr.bf16.mxu0 %v4012_v16  ;;  %2591 = vmatpush1.bf16.msra.mxu1 %v4076_v48 }
 0x199   : > { %2592 = vmatprep.subr.bf16.mxu1 %v4084_v49 }
 0x19b   : > { %2552 = vmatpush2.bf16.msra.mxu0 %v4010_v17 }
 0x19c   : > { %2553 = vmatprep.subr.bf16.mxu0 %v4015_v18  ;;  %2593 = vmatpush2.bf16.msra.mxu1 %v4082_v50 }
 0x19d   : > { %2594 = vmatprep.subr.bf16.mxu1 %v4090_v51  ;;  %v4073_v51 = vld [vmem:[%s4599_s11 + $0x28] ss:$16 sps:$4 sm:$0xff]  }
 0x19f   : > { %2554 = vmatpush2.bf16.msra.mxu0 %v4013_v19 }
 0x1a0   : > { %2555 = vmatprep.subr.bf16.mxu0 %v4018_v20  ;;  %2595 = vmatpush2.bf16.msra.mxu1 %v4088_v52 }
 0x1a1   : > { %2596 = vmatprep.subr.bf16.mxu1 %v4096_v53  ;;  %v4081_v53 = vld [vmem:[%s4599_s11 + $0xc] ss:$16 sps:$4 sm:$0xff]  }
 0x1a3   : > { %2556 = vmatpush2.bf16.msra.mxu0 %v4016_v21 }
 0x1a4   : > { %2557 = vmatprep.subr.bf16.mxu0 %v4021_v22  ;;  %2597 = vmatpush2.bf16.msra.mxu1 %v4094_v55 }
 0x1a5   : > { %2598 = vmatprep.subr.bf16.mxu1 %v4102_v56 }
 0x1a7   : > { %2558 = vmatpush2.bf16.msra.mxu0 %v4019_v23 }
 0x1a8   : > { %2559 = vmatprep.subr.bf16.mxu0 %v4024_v26  ;;  %2599 = vmatpush2.bf16.msra.mxu1 %v4100_v58 }
 0x1a9   : > { %2600 = vmatprep.subr.bf16.mxu1 %v4108_v59 }
 0x1ab   : > { %2560 = vmatpush2.bf16.msra.mxu0 %v4022_v27 }
 0x1ac   : > { %2561 = vmatprep.subr.bf16.mxu0 %v4027_v30  ;;  %2601 = vmatpush2.bf16.msra.mxu1 %v4106_v60 }
 0x1ad   : > { %2602 = vmatprep.subr.bf16.mxu1 %v4114_v61 }
 0x1af   : > { %2562 = vmatpush2.bf16.msra.mxu0 %v4025_v31 }
 0x1b0   : > { %2563 = vmatprep.subr.bf16.mxu0 %v4030_v34  ;;  %2603 = vmatpush2.bf16.msra.mxu1 %v4112_v62 }
 0x1b1   : > { %2604 = vmatprep.subr.bf16.mxu1 %v4120_v63  ;;  %v4079_v63 = vld [vmem:[%s4599_s11 + $0x8] ss:$16 sps:$4 sm:$0xff]  }
 0x1b3   : > { %2564 = vmatpush2.bf16.msra.mxu0 %v4028_v35  ;;  %v4045_v35 = vld [vmem:[%s4599_s11 + $0xcc] ss:$16 sps:$4 sm:$0xff]  }
 0x1b4   : > { %2565 = vmatprep.subr.bf16.mxu0 %v4033_v38  ;;  %2605 = vmatpush2.bf16.msra.mxu1 %v4118_v0  ;;  %v4049_v38 = vld [vmem:[%s4599_s11 + $0xa8] ss:$16 sps:$4 sm:$0xff]  }
 0x1b5   : > { %2606 = vmatprep.subr.bf16.mxu1 %v4126_v1  ;;  %v4087_v1 = vld [vmem:[%s4599_s11 + $0x1ec] ss:$16 sps:$4 sm:$0xff]  }
 0x1b7   : > { %2566 = vmatpush2.bf16.msra.mxu0 %v4031_v39  ;;  %v4057_v39 = vld [vmem:[%s4599_s11 + $0x8c] ss:$16 sps:$4 sm:$0xff]  }
 0x1b8   : > { %2617 = vmatprep.subr.bf16.mxu0 %v4039_v42  ;;  %2607 = vmatpush2.bf16.msra.mxu1 %v4124_v2  ;;  %v4061_v42 = vld [vmem:[%s4599_s11 + $0x68] ss:$16 sps:$4 sm:$0xff]  }
 0x1b9   : > { %2658 = vmatprep.subr.bf16.mxu1 %v4132_v3 }
 0x1fa   : > { %v1583_v5 = vpop.f32.mrf.mxu0 }
 0x1fb   : > { %v1584_v6 = vadd.f32 %v1583_v5, %v892_v54  ;;  %v1624_v7 = vpop.f32.mrf.mxu1  ;;  %v4093_v54 = vld [vmem:[%s4599_s11 + $0x1cc] ss:$16 sps:$4 sm:$0xff]  }
 0x1fc   : > { %v1585_v8 = vpop.f32.mrf.mxu0  ;;  %v4099_v5 = vld [vmem:[%s4599_s11 + $0x1ac] ss:$16 sps:$4 sm:$0xff]  }
 0x1fd   : > { %v1625_v10 = vadd.f32 %v1624_v7, %v1584_v6  ;;  %v1586_v13 = vadd.f32 %v1585_v8, %v896_v57  ;;  %v1626_v16 = vpop.f32.mrf.mxu1  ;;  %v4091_v57 = vld [vmem:[%s4599_s11 + $0x1c8] ss:$16 sps:$4 sm:$0xff]   ;;  %v4105_v7 = vld [vmem:[%s4599_s11 + $0x18c] ss:$16 sps:$4 sm:$0xff]  }
 0x1fe   : > { %v1587_v17 = vpop.f32.mrf.mxu0  ;;  %v4097_v6 = vld [vmem:[%s4599_s11 + $0x1a8] ss:$16 sps:$4 sm:$0xff]  }
 0x1ff   : > { %v3495_v18 = vmul.f32 -1.442695, %v1625_v10  ;;  %v1627_v19 = vadd.f32 %v1626_v16, %v1586_v13  ;;  %v1628_v20 = vpop.f32.mrf.mxu1  ;;  %v4103_v13 = vld [vmem:[%s4599_s11 + $0x188] ss:$16 sps:$4 sm:$0xff]   ;;  %v4111_v17 = vld [vmem:[%s4599_s11 + $0x16c] ss:$16 sps:$4 sm:$0xff]  }
 0x200   : > { %v1588_v21 = vpop.f32.mrf.mxu0  ;;  %v4117_v20 = vld [vmem:[%s4599_s11 + $0x14c] ss:$16 sps:$4 sm:$0xff]  }
 0x201   : > { %4226 = vpow2.f32 %v3495_v18  ;;  %v3496_v22 = vmul.f32 -1.442695, %v1627_v19  ;;  %v1629_v23 = vpop.f32.mrf.mxu1  ;;  %v4115_v21 = vld [vmem:[%s4599_s11 + $0x148] ss:$16 sps:$4 sm:$0xff]  }
 0x202   : > { %v4121_v23 = vld [vmem:[%s4599_s11 + $0x128] ss:$16 sps:$4 sm:$0xff]  }
 0x203   : > { %4228 = vpow2.f32 %v3496_v22  ;;  %v4123_v22 = vld [vmem:[%s4599_s11 + $0x12c] ss:$16 sps:$4 sm:$0xff]  }
 0x20e   : > { %v4227_v24 = vpop.eup %4226 }
 0x20f   : > { %v1725_v25 = vadd.f32 1.0, %v4227_v24  ;;  %v4129_v24 = vld [vmem:[%s4599_s11 + $0x10c] ss:$16 sps:$4 sm:$0xff]  }
 0x210   : > { %v4229_v26 = vpop.eup %4228 }
 0x211   : > { %4230 = vrcp.f32 %v1725_v25  ;;  %v1726_v27 = vadd.f32 1.0, %v4229_v26  ;;  %v4127_v26 = vld [vmem:[%s4599_s11 + $0x108] ss:$16 sps:$4 sm:$0xff]  }
 0x213   : > { %4232 = vrcp.f32 %v1726_v27 }
 0x21e   : > { %v4231_v28 = vpop.eup %4230 }
 0x21f   : > { %v1737_v30 = vmul.f32 %v4231_v28, %v1625_v10 }
 0x220   : > { %v4233_v29 = vpop.eup %4232 }
 0x221   : > { %v1738_v31 = vmul.f32 %v4233_v29, %v1627_v19  ;;  %v4856_v34 = vpack.c.bf16 %v1737_v30, %v1737_v30  ;;  %v4109_v19 = vld [vmem:[%s4599_s11 + $0x168] ss:$16 sps:$4 sm:$0xff]  }
 0x223   : > { %v1742_v32 = vpack.c.bf16 %v1738_v31, %v1738_v31  ;;  %v4130_v31 = vld [vmem:[%s4599_s11 + $0x2e8] ss:$16 sps:$4 sm:$0xff]  }
 0x225   : > { %2567 = vmatprep.mubr.bf16.mxu0 %v1742_v32 }
 0x226   : > { %2568 = vmatmul.mubr.bf16.vlgmr.msra.gmra.mxu0 %v4856_v34 }
 0x227   : > { %2618 = vmatpush1.bf16.msra.mxu0 %v4037_v33  ;;  %2649 = vmatprep.mubr.bf16.mxu0 %v1742_v32  ;;  %v4135_v33 = vld [vmem:[%s4599_s11 + $0x2cc] ss:$16 sps:$4 sm:$0xff]  }
 0x228   : > { %2619 = vmatprep.subr.bf16.mxu0 %v4045_v35  ;;  %v4133_v35 = vld [vmem:[%s4599_s11 + $0x2c8] ss:$16 sps:$4 sm:$0xff]  }
 0x22b   : > { %2620 = vmatpush1.bf16.msra.mxu0 %v4043_v36  ;;  %v4138_v36 = vld [vmem:[%s4599_s11 + $0x2ac] ss:$16 sps:$4 sm:$0xff]  }
 0x22c   : > { %2621 = vmatprep.subr.bf16.mxu0 %v4051_v37  ;;  %v4136_v37 = vld [vmem:[%s4599_s11 + $0x2a8] ss:$16 sps:$4 sm:$0xff]  }
 0x22f   : > { %2622 = vmatpush1.bf16.msra.mxu0 %v4049_v38  ;;  %v4141_v38 = vld [vmem:[%s4599_s11 + $0x28c] ss:$16 sps:$4 sm:$0xff]  }
 0x230   : > { %2623 = vmatprep.subr.bf16.mxu0 %v4057_v39  ;;  %v4139_v39 = vld [vmem:[%s4599_s11 + $0x288] ss:$16 sps:$4 sm:$0xff]  }
 0x233   : > { %2624 = vmatpush1.bf16.msra.mxu0 %v4055_v40  ;;  %v4144_v40 = vld [vmem:[%s4599_s11 + $0x26c] ss:$16 sps:$4 sm:$0xff]  }
 0x234   : > { %2625 = vmatprep.subr.bf16.mxu0 %v4063_v41  ;;  %v4147_v41 = vld [vmem:[%s4599_s11 + $0x24c] ss:$16 sps:$4 sm:$0xff]  }
 0x237   : > { %2626 = vmatpush1.bf16.msra.mxu0 %v4061_v42  ;;  %v4145_v42 = vld [vmem:[%s4599_s11 + $0x248] ss:$16 sps:$4 sm:$0xff]  }
 0x238   : > { %2627 = vmatprep.subr.bf16.mxu0 %v4069_v43  ;;  %v4150_v43 = vld [vmem:[%s4599_s11 + $0x22c] ss:$16 sps:$4 sm:$0xff]  }
 0x23a   : > { %v1665_v48 = vpop.f32.mrf.mxu0 }
 0x23b   : > { %v1666_v49 = vadd.f32 %v1665_v48, %v900_v44  ;;  %v1706_v50 = vpop.f32.mrf.mxu1  ;;  %2628 = vmatpush1.bf16.msra.mxu0 %v4067_v45  ;;  %v4148_v44 = vld [vmem:[%s4599_s11 + $0x228] ss:$16 sps:$4 sm:$0xff]   ;;  %v4153_v45 = vld [vmem:[%s4599_s11 + $0x20c] ss:$16 sps:$4 sm:$0xff]  }
 0x23c   : > { %v1667_v52 = vpop.f32.mrf.mxu0  ;;  %2629 = vmatprep.subr.bf16.mxu0 %v4075_v46  ;;  %v4151_v46 = vld [vmem:[%s4599_s11 + $0x208] ss:$16 sps:$4 sm:$0xff]  }
 0x23d   : > { %v1707_v55 = vadd.f32 %v1706_v50, %v1666_v49  ;;  %v1668_v56 = vadd.f32 %v1667_v52, %v904_v47  ;;  %v1708_v58 = vpop.f32.mrf.mxu1  ;;  %v4156_v47 = vld [vmem:[%s4599_s11 + $0x3ec] ss:$16 sps:$4 sm:$0xff]   ;;  %v4154_v48 = vld [vmem:[%s4599_s11 + $0x3e8] ss:$16 sps:$4 sm:$0xff]  }
 0x23e   : > { %v1669_v59 = vpop.f32.mrf.mxu0  ;;  %v4159_v49 = vld [vmem:[%s4599_s11 + $0x3cc] ss:$16 sps:$4 sm:$0xff]   ;;  %v4157_v50 = vld [vmem:[%s4599_s11 + $0x3c8] ss:$16 sps:$4 sm:$0xff]  }
 0x23f   : > { %v3497_v60 = vmul.f32 -1.442695, %v1707_v55  ;;  %v1709_v61 = vadd.f32 %v1708_v58, %v1668_v56  ;;  %v1710_v62 = vpop.f32.mrf.mxu1  ;;  %2630 = vmatpush1.bf16.msra.mxu0 %v4073_v51  ;;  %v4162_v51 = vld [vmem:[%s4599_s11 + $0x3ac] ss:$16 sps:$4 sm:$0xff]   ;;  %v4160_v52 = vld [vmem:[%s4599_s11 + $0x3a8] ss:$16 sps:$4 sm:$0xff]  }
 0x240   : > { %v1670_v0 = vpop.f32.mrf.mxu0  ;;  %2631 = vmatprep.subr.bf16.mxu0 %v4081_v53  ;;  %v4165_v53 = vld [vmem:[%s4599_s11 + $0x38c] ss:$16 sps:$4 sm:$0xff]   ;;  %v4166_v58 = vld [vmem:[%s4599_s11 + $0x368] ss:$16 sps:$4 sm:$0xff]  }
 0x241   : > { %4234 = vpow2.f32 %v3497_v60  ;;  %v3498_v2 = vmul.f32 -1.442695, %v1709_v61  ;;  %v1711_v3 = vpop.f32.mrf.mxu1  ;;  %v4168_v56 = vld [vmem:[%s4599_s11 + $0x36c] ss:$16 sps:$4 sm:$0xff]   ;;  %v4169_v60 = vld [vmem:[%s4599_s11 + $0x348] ss:$16 sps:$4 sm:$0xff]  }
 0x242   : > { %v4171_v59 = vld [vmem:[%s4599_s11 + $0x34c] ss:$16 sps:$4 sm:$0xff]   ;;  %v4172_v62 = vld [vmem:[%s4599_s11 + $0x328] ss:$16 sps:$4 sm:$0xff]   ;;  %v4180_v3 = vld [vmem:[%s4685_s14 + $0x70] sm:$0xff]  }
 0x243   : > { %4236 = vpow2.f32 %v3498_v2  ;;  %2632 = vmatpush1.bf16.msra.mxu0 %v4079_v63  ;;  %v4177_v63 = vld [vmem:[%s4599_s11 + $0x30c] ss:$16 sps:$4 sm:$0xff]   ;;  %v4175_v0 = vld [vmem:[%s4599_s11 + $0x308] ss:$16 sps:$4 sm:$0xff]  }
 0x244   : > { %2633 = vmatprep.subr.bf16.mxu0 %v4087_v1  ;;  %v4178_v1 = vld [vmem:[%s4685_s14 + $0x78] sm:$0xff]  }
 0x245   : > { %v4179_v2 = vld [vmem:[%s4685_s14 + $0x38] sm:$0xff]  }
 0x247   : > { %2634 = vmatpush2.bf16.msra.mxu0 %v4085_v4  ;;  %v4181_v4 = vld [vmem:[%s4685_s14 + $0x30] sm:$0xff]  }
 0x248   : > { %2635 = vmatprep.subr.bf16.mxu0 %v4093_v54  ;;  %v4182_v54 = vld [vmem:[%s4685_s14 + $0x68] sm:$0xff]  }
 0x24b   : > { %2636 = vmatpush2.bf16.msra.mxu0 %v4091_v57  ;;  %v4183_v57 = vld [vmem:[%s4685_s14 + $0x28] sm:$0xff]  }
 0x24c   : > { %2637 = vmatprep.subr.bf16.mxu0 %v4099_v5  ;;  %v4184_v5 = vld [vmem:[%s4685_s14 + $0x60] sm:$0xff]  }
 0x24e   : > { %v4235_v8 = vpop.eup %4234 }
 0x24f   : > { %v1727_v10 = vadd.f32 1.0, %v4235_v8  ;;  %2638 = vmatpush2.bf16.msra.mxu0 %v4097_v6  ;;  %v4185_v6 = vld [vmem:[%s4685_s14 + $0x20] sm:$0xff]   ;;  %v4187_v8 = vld [vmem:[%s4685_s14 + $0x18] sm:$0xff]  }
 0x250   : > { %v4237_v16 = vpop.eup %4236  ;;  %2639 = vmatprep.subr.bf16.mxu0 %v4105_v7  ;;  %v4186_v7 = vld [vmem:[%s4685_s14 + $0x58] sm:$0xff]  }
 0x251   : > { %4238 = vrcp.f32 %v1727_v10  ;;  %v1728_v18 = vadd.f32 1.0, %v4237_v16  ;;  %v4188_v10 = vld [vmem:[%s4685_s14 + $0x50] sm:$0xff]   ;;  %v4190_v16 = vld [vmem:[%s4685_s14 + $0x48] sm:$0xff]  }
 0x253   : > { %4240 = vrcp.f32 %v1728_v18  ;;  %2640 = vmatpush2.bf16.msra.mxu0 %v4103_v13  ;;  %v4189_v13 = vld [vmem:[%s4685_s14 + $0x10] sm:$0xff]   ;;  %v4192_v18 = vld [vmem:[%s4685_s14 + $0x40] sm:$0xff]  }
 0x254   : > { %2641 = vmatprep.subr.bf16.mxu0 %v4111_v17  ;;  %v4191_v17 = vld [vmem:[%s4685_s14 + $0x8] sm:$0xff]  }
 0x257   : > { %2642 = vmatpush2.bf16.msra.mxu0 %v4109_v19  ;;  %v4193_v19 = vld [vmem:[%s4685_s14] sm:$0xff]  }
 0x258   : > { %2643 = vmatprep.subr.bf16.mxu0 %v4117_v20 }
 0x25b   : > { %2644 = vmatpush2.bf16.msra.mxu0 %v4115_v21 }
 0x25c   : > { %2645 = vmatprep.subr.bf16.mxu0 %v4123_v22 }
 0x25e   : > { %v4239_v25 = vpop.eup %4238 }
 0x25f   : > { %2646 = vmatpush2.bf16.msra.mxu0 %v4121_v23  ;;  %v1739_v28 = vmul.f32 %v4239_v25, %v1707_v55  ;;  %v4163_v55 = vld [vmem:[%s4599_s11 + $0x388] ss:$16 sps:$4 sm:$0xff]  }
 0x260   : > { %v4241_v27 = vpop.eup %4240  ;;  %2647 = vmatprep.subr.bf16.mxu0 %v4129_v24  ;;  %v4194_v24 = vld [vmem:[%s4685_s14 + $0xf8] sm:$0xff]  }
 0x261   : > { %v1740_v29 = vmul.f32 %v4241_v27, %v1709_v61  ;;  %v4894_v32 = vpack.c.bf16 %v1739_v28, %v1739_v28  ;;  %v4174_v61 = vld [vmem:[%s4599_s11 + $0x32c] ss:$16 sps:$4 sm:$0xff]   ;;  %v4197_v27 = vld [vmem:[%s4685_s14 + $0xb0] sm:$0xff]  }
 0x262   : > { %v4195_v25 = vld [vmem:[%s4685_s14 + $0xb8] sm:$0xff]   ;;  %v4198_v28 = vld [vmem:[%s4685_s14 + $0xe8] sm:$0xff]  }
 0x263   : > { %v1744_v30 = vpack.c.bf16 %v1740_v29, %v1740_v29  ;;  %2648 = vmatpush2.bf16.msra.mxu0 %v4127_v26  ;;  %v4196_v26 = vld [vmem:[%s4685_s14 + $0xf0] sm:$0xff]   ;;  %v4199_v29 = vld [vmem:[%s4685_s14 + $0xa8] sm:$0xff]  }
 0x264   : > { %3674 = vmatprep.subr.bf16.mxu0 %v4178_v1 }
 0x265   : > { %2608 = vmatprep.mubr.bf16.mxu1 %v1744_v30 }
 0x266   : > { %2609 = vmatmul.mubr.bf16.vlgmr.msra.gmra.mxu1 %v4894_v32  ;;  %2650 = vmatmul.mubr.bf16.vlgmr.msra.gmra.mxu0 %v4856_v34  ;;  %v4142_v34 = vld [vmem:[%s4599_s11 + $0x268] ss:$16 sps:$4 sm:$0xff]  }
 0x267   : > { %2659 = vmatpush1.bf16.msra.mxu1 %v4130_v31  ;;  %2690 = vmatprep.mubr.bf16.mxu1 %v1744_v30  ;;  %v4200_v30 = vld [vmem:[%s4685_s14 + $0xe0] sm:$0xff]  }
 0x268   : > { %2660 = vmatprep.subr.bf16.mxu1 %v4135_v33  ;;  %3675 = vmatpush3.bf16.msra.mxu0 %v4179_v2  ;;  %v4201_v31 = vld [vmem:[%s4685_s14 + $0xa0] sm:$0xff]   ;;  %v4203_v33 = vld [vmem:[%s4685_s14 + $0x98] sm:$0xff]  }
 0x269   : > { %3676 = vmatprep.subr.bf16.mxu0 %v4180_v3 }
 0x26b   : > { %2661 = vmatpush1.bf16.msra.mxu1 %v4133_v35  ;;  %v4204_v35 = vld [vmem:[%s4685_s14 + $0xd0] sm:$0xff]  }
 0x26c   : > { %2662 = vmatprep.subr.bf16.mxu1 %v4138_v36  ;;  %3677 = vmatpush3.bf16.msra.mxu0 %v4181_v4  ;;  %v4205_v36 = vld [vmem:[%s4685_s14 + $0x90] sm:$0xff]  }
 0x26d   : > { %3678 = vmatprep.subr.bf16.mxu0 %v4182_v54 }
 0x26f   : > { %2663 = vmatpush1.bf16.msra.mxu1 %v4136_v37  ;;  %v4206_v37 = vld [vmem:[%s4685_s14 + $0xc8] sm:$0xff]  }
 0x270   : > { %2664 = vmatprep.subr.bf16.mxu1 %v4141_v38  ;;  %3679 = vmatpush3.bf16.msra.mxu0 %v4183_v57  ;;  %v4207_v38 = vld [vmem:[%s4685_s14 + $0x88] sm:$0xff]  }
 0x271   : > { %3680 = vmatprep.subr.bf16.mxu0 %v4184_v5 }
 0x273   : > { %2665 = vmatpush1.bf16.msra.mxu1 %v4139_v39  ;;  %v4208_v39 = vld [vmem:[%s4685_s14 + $0xc0] sm:$0xff]  }
 0x274   : > { %2666 = vmatprep.subr.bf16.mxu1 %v4144_v40  ;;  %3681 = vmatpush3.bf16.msra.mxu0 %v4185_v6  ;;  %v4209_v40 = vld [vmem:[%s4685_s14 + $0x80] sm:$0xff]  }
 0x275   : > { %3682 = vmatprep.subr.bf16.mxu0 %v4186_v7 }
 0x277   : > { %2667 = vmatpush1.bf16.msra.mxu1 %v4142_v34  ;;  %v1873_v34 = vld [vmem:[%s583_s13] sm:$0xf]  ;;  %s4985_s13 = scalar_lea.hbm %s5066_s29, %s3667_s15 }
 0x278   : > { %2668 = vmatprep.subr.bf16.mxu1 %v4147_v41  ;;  %3683 = vmatpush3.bf16.msra.mxu0 %v4187_v8  ;;  %v1878_v41 = vrot.slane %v1873_v34, %v4697_v11  ;;  %v1886_v3 = vrot.slane %v1873_v34, %v4699_v12  ;;  %v1890_v4 = vrot.slane %v1873_v34, %v4703_v15 }
 0x279   : > { %3684 = vmatprep.subr.bf16.mxu0 %v4188_v10 }
 0x27b   : > { %2669 = vmatpush1.bf16.msra.mxu1 %v4145_v42  ;;  %v1882_v42 = vrot.slane %v1873_v34, %v4701_v14 }
 0x27c   : > { %2670 = vmatprep.subr.bf16.mxu1 %v4150_v43  ;;  %3685 = vmatpush3.bf16.msra.mxu0 %v4189_v13 }
 0x27d   : > { %3686 = vmatprep.subr.bf16.mxu0 %v4190_v16 }
 0x27f   : > { %2671 = vmatpush1.bf16.msra.mxu1 %v4148_v44 }
 0x280   : > { %2672 = vmatprep.subr.bf16.mxu1 %v4153_v45  ;;  %3687 = vmatpush3.bf16.msra.mxu0 %v4191_v17 }
 0x281   : > { %3688 = vmatprep.subr.bf16.mxu0 %v4192_v18 }
 0x283   : > { %2673 = vmatpush1.bf16.msra.mxu1 %v4151_v46 }
 0x284   : > { %2674 = vmatprep.subr.bf16.mxu1 %v4156_v47  ;;  %3689 = vmatpush3.bf16.msra.mxu0 %v4193_v19 }
 0x287   : > { %2675 = vmatpush2.bf16.msra.mxu1 %v4154_v48 }
 0x288   : > { %2676 = vmatprep.subr.bf16.mxu1 %v4159_v49 }
 0x28b   : > { %2677 = vmatpush2.bf16.msra.mxu1 %v4157_v50 }
 0x28c   : > { %2678 = vmatprep.subr.bf16.mxu1 %v4162_v51 }
 0x28f   : > { %2679 = vmatpush2.bf16.msra.mxu1 %v4160_v52 }
 0x290   : > { %2680 = vmatprep.subr.bf16.mxu1 %v4165_v53 }
 0x293   : > { %2681 = vmatpush2.bf16.msra.mxu1 %v4163_v55 }
 0x294   : > { %2682 = vmatprep.subr.bf16.mxu1 %v4168_v56 }
 0x297   : > { %2683 = vmatpush2.bf16.msra.mxu1 %v4166_v58 }
 0x298   : > { %2684 = vmatprep.subr.bf16.mxu1 %v4171_v59 }
 0x29b   : > { %2685 = vmatpush2.bf16.msra.mxu1 %v4169_v60 }
 0x29c   : > { %2686 = vmatprep.subr.bf16.mxu1 %v4174_v61 }
 0x29f   : > { %2687 = vmatpush2.bf16.msra.mxu1 %v4172_v62 }
 0x2a0   : > { %2688 = vmatprep.subr.bf16.mxu1 %v4177_v63 }
 0x2a3   : > { %2689 = vmatpush2.bf16.msra.mxu1 %v4175_v0 }
 0x2a4   : > { %3696 = vmatprep.subr.bf16.mxu1 %v4194_v24 }
 0x2a6   : > { %2691 = vmatmul.mubr.bf16.vlgmr.msra.gmra.mxu1 %v4894_v32  ;;  %v4202_v32 = vld [vmem:[%s4685_s14 + $0xd8] sm:$0xff]  }
 0x2a7   : > { %3697 = vmatpush3.bf16.msra.mxu1 %v4195_v25 }
 0x2a8   : > { %3698 = vmatprep.subr.bf16.mxu1 %v4196_v26 }
 0x2ab   : > { %3699 = vmatpush3.bf16.msra.mxu1 %v4197_v27 }
 0x2ac   : > { %3700 = vmatprep.subr.bf16.mxu1 %v4198_v28 }
 0x2af   : > { %3701 = vmatpush3.bf16.msra.mxu1 %v4199_v29 }
 0x2b0   : > { %3702 = vmatprep.subr.bf16.mxu1 %v4200_v30 }
 0x2b3   : > { %3703 = vmatpush3.bf16.msra.mxu1 %v4201_v31  ;;  %v3631_v31 = vld [vmem:[%s591_s19] ss:$0 sm:$0xff]  ;;  %s4326_s19 = sshll.u32 %s4413_s20, 4  ;;  %s4327_s19 = int_to_ptr.vmem [resolvable:$false] %s4326_s19 }
 0x2b4   : > { %3704 = vmatprep.subr.bf16.mxu1 %v4202_v32  ;;  %s4328_s25 = scalar_lea.vmem %s4327_s19, 256  ;;  %p4329_p6 = scmp.lt.s32.totalorder %s3150_s26, %s4327_s19 }
 0x2b5   : > { %p4330_p4 = scmp.lt.s32.totalorder %s4328_s25, %s4322_s27 }
 0x2b7   : > { %3705 = vmatpush3.bf16.msra.mxu1 %v4203_v33  ;;  %p4331_p7 = por %p4330_p4, %p4329_p6 }
 0x2b8   : > { %3706 = vmatprep.subr.bf16.mxu1 %v4204_v35 }
 0x2b9   : > { %p4332_p10 = pnand %p4331_p7, %p4325_p5 }
 0x2bb   : > { %3707 = vmatpush3.bf16.msra.mxu1 %v4205_v36 }
 0x2bc   : > { %3708 = vmatprep.subr.bf16.mxu1 %v4206_v37  ;;  %v3664_v37 = vld [vmem:[%s5036_s9] ss:$0 sm:$0xff] }
 0x2bf   : > { %3709 = vmatpush3.bf16.msra.mxu1 %v4207_v38 }
 0x2c0   : > { %3710 = vmatprep.subr.bf16.mxu1 %v4208_v39 }
 0x2c3   : > { %3711 = vmatpush3.bf16.msra.mxu1 %v4209_v40 }
 0x2e6   : > { %v2569_v20 = vpop.f32.mrf.mxu0 }
 0x2e7   : > { %v2570_v43 = vadd.f32 %v2569_v20, %v1878_v41 }
 0x2e8   : > { %v2571_v21 = vpop.f32.mrf.mxu0 }
 0x2e9   : > { %v2572_v46 = vadd.f32 %v2571_v21, %v1882_v42 }
 0x2ea   : > { %v2573_v22 = vpop.f32.mrf.mxu0 }
 0x2ec   : > { %v2574_v23 = vpop.f32.mrf.mxu0 }
 0x326   : > { %v2610_v44 = vpop.f32.mrf.mxu1  ;;  %v2651_v45 = vpop.f32.mrf.mxu0 }
 0x327   : > { %v2611_v47 = vadd.f32 %v2610_v44, %v2570_v43  ;;  %v2652_v54 = vadd.f32 %v2651_v45, %v1886_v3 }
 0x328   : > { %v2612_v48 = vpop.f32.mrf.mxu1  ;;  %v2653_v49 = vpop.f32.mrf.mxu0 }
 0x329   : > { %v3627_v50 = vmul.f32 -1.442695, %v2611_v47  ;;  %v2613_v51 = vadd.f32 %v2612_v48, %v2572_v46  ;;  %v2654_v5 = vadd.f32 %v2653_v49, %v1890_v4 }
 0x32a   : > { %v2614_v52 = vpop.f32.mrf.mxu1  ;;  %v2655_v53 = vpop.f32.mrf.mxu0 }
 0x32b   : > { %4242 = vpow2.f32 %v3627_v50  ;;  %v3628_v55 = vmul.f32 -1.442695, %v2613_v51 }
 0x32c   : > { %v2615_v56 = vpop.f32.mrf.mxu1  ;;  %v2656_v58 = vpop.f32.mrf.mxu0 }
 0x32d   : > { %4244 = vpow2.f32 %v3628_v55  ;;  %v3665_v56 = vld [vmem:[%s5064_s16] ss:$0 sm:$0xff] }
 0x338   : > { %v4243_v59 = vpop.eup %4242 }
 0x339   : > { %v2711_v11 = vadd.f32 1.0, %v4243_v59 }
 0x33a   : > { %v4245_v60 = vpop.eup %4244 }
 0x33b   : > { %4246 = vrcp.f32 %v2711_v11  ;;  %v2712_v14 = vadd.f32 1.0, %v4245_v60 }
 0x33d   : > { %4248 = vrcp.f32 %v2712_v14 }
 0x348   : > { %v4247_v61 = vpop.eup %4246 }
 0x349   : > { %v2723_v63 = vmul.f32 %v4247_v61, %v2611_v47 }
 0x34a   : > { %v4249_v62 = vpop.eup %4248 }
 0x34b   : > { %v2724_v0 = vmul.f32 %v4249_v62, %v2613_v51  ;;  %v2727_v2 = vpack.c.bf16 %v2723_v63, %v2723_v63 }
 0x34d   : > { %v2728_v1 = vpack.c.bf16 %v2724_v0, %v2724_v0 }
 0x34f   : > { %3026 = vmatprep.mubr.bf16.mxu0 %v2728_v1 }
 0x350   : > { %3027 = vmatmul.mubr.bf16.vlgmr.msra.gmra.mxu0 %v2727_v2 }
 0x366   : > { %v2692_v57 = vpop.f32.mrf.mxu1 }
 0x367   : > { %v2693_v6 = vadd.f32 %v2692_v57, %v2652_v54 }
 0x368   : > { %v2694_v7 = vpop.f32.mrf.mxu1 }
 0x369   : > { %v3629_v8 = vmul.f32 -1.442695, %v2693_v6  ;;  %v2695_v10 = vadd.f32 %v2694_v7, %v2654_v5  ;;  %v3129_v5 = vand.u32 127, %v601_v9 }
 0x36a   : > { %v2696_v13 = vpop.f32.mrf.mxu1 }
 0x36b   : > { %4250 = vpow2.f32 %v3629_v8  ;;  %v3630_v16 = vmul.f32 -1.442695, %v2695_v10  ;;  %vm3130_vm5 = vcmp.ge.s32.totalorder %v3129_v5, 4 }
 0x36c   : > { %v2697_v17 = vpop.f32.mrf.mxu1 }
 0x36d   : > { %4252 = vpow2.f32 %v3630_v16 }
 0x378   : > { %v4251_v18 = vpop.eup %4250 }
 0x379   : > { %v2713_v19 = vadd.f32 1.0, %v4251_v18 }
 0x37a   : > { %v4253_v20 = vpop.eup %4252 }
 0x37b   : > { %4254 = vrcp.f32 %v2713_v19  ;;  %v2714_v12 = vadd.f32 1.0, %v4253_v20 }
 0x37d   : > { %4256 = vrcp.f32 %v2714_v12 }
 0x388   : > { %v4255_v15 = vpop.eup %4254 }
 0x389   : > { %v2725_v22 = vmul.f32 %v4255_v15, %v2693_v6 }
 0x38a   : > { %v4257_v21 = vpop.eup %4256 }
 0x38b   : > { %v2726_v23 = vmul.f32 %v4257_v21, %v2695_v10  ;;  %v2729_v25 = vpack.c.bf16 %v2725_v22, %v2725_v22 }
 0x38d   : > { %v2730_v24 = vpack.c.bf16 %v2726_v23, %v2726_v23 }
 0x38f   : > { %3066 = vmatprep.mubr.bf16.mxu1 %v2730_v24 }
 0x390   : > { %3067 = vmatmul.mubr.bf16.vlgmr.msra.gmra.mxu1 %v2729_v25 }
 0x410   : > { %v3690_v26 = vpop.f32.mrf.mxu0 }
 0x412   : > { %v3691_v27 = vpop.f32.mrf.mxu0 }
 0x413   : > { %v3692_v30 = vadd.f32 %v3691_v27, %v3690_v26 }
 0x414   : > { %v3693_v28 = vpop.f32.mrf.mxu0 }
 0x415   : > { %v3029_v35 = vadd.f32 %v3692_v30, %v3631_v31 }
 0x416   : > { %v3694_v29 = vpop.f32.mrf.mxu0 }
 0x450   : > { %v3712_v32 = vpop.f32.mrf.mxu1 }
 0x452   : > { %v3713_v33 = vpop.f32.mrf.mxu1 }
 0x453   : > { %v3714_v36 = vadd.f32 %v3713_v33, %v3712_v32 }
 0x454   : > { %v3715_v38 = vpop.f32.mrf.mxu1 }
 0x455   : > { %v3069_v39 = vadd.f32 %v3714_v36, %v3029_v35 }
 0x456   : > { %v3716_v40 = vpop.f32.mrf.mxu1 }
 0x457   : > { %v3082_v34 = vsub.f32 %v3664_v37, %v3069_v39 }
 0x459   : > { %v3086_v41 = vand.u32 2147483647, %v3082_v34  ;;  %v3083_v52 = vmax.f32 %v3082_v34, 0.0  ;;  %vm3084_vm2 = vcmp.ne.f32.partialorder %v3082_v34, %v3082_v34 }
 0x45b   : > { %v3087_v42 = vsub.f32 0.0, %v3086_v41 }
 0x45d   : > { %v3088_v43 = vmul.f32 1.442695, %v3087_v42 }
 0x45f   : > { %4258 = vpow2.f32 %v3088_v43 }
 0x46c   : > { %v4259_v44 = vpop.eup %4258 }
 0x46d   : > { %v3090_v45 = vadd.f32 1.0, %v4259_v44  ;;  %v3093_v46 = vmul.f32 -0.5, %v4259_v44  ;;  %v3096_v48 = vand.u32 2147483647, %v4259_v44 }
 0x46f   : > { %4260 = vlog2.f32 %v3090_v45  ;;  %v3094_v47 = vadd.f32 1.0, %v3093_v46  ;;  %vm3097_vm1 = vcmp.lt.f32.partialorder %v3096_v48, 0.0004427343 }
 0x471   : > { %v3095_v51 = vmul.f32 %v4259_v44, %v3094_v47 }
 0x47c   : > { %v4261_v49 = vpop.eup %4260 }
 0x47d   : > { %v3092_v50 = vmul.f32 0.6931472, %v4261_v49 }
 0x47f   : > { %v3098_v53 = vsel %vm3097_vm1, %v3095_v51, %v3092_v50 }
 0x480   : > { %v3099_v55 = vadd.f32 %v3098_v53, %v3083_v52 }
 0x482   : > { %v3100_v58 = vsel %vm3084_vm2, %v3082_v34, %v3099_v55 }
 0x483   : > { %v3101_v59 = vsub.f32 %v3664_v37, %v3100_v58 }
 0x485   : > { %v3108_v11 = vsub.f32 %v3101_v59, %v3665_v56 }
 0x487   : > { %v3112_v60 = vand.u32 2147483647, %v3108_v11  ;;  %v3109_v57 = vmax.f32 %v3108_v11, 0.0  ;;  %vm3110_vm4 = vcmp.ne.f32.partialorder %v3108_v11, %v3108_v11 }
 0x489   : > { %v3113_v14 = vsub.f32 0.0, %v3112_v60 }
 0x48b   : > { %v3114_v61 = vmul.f32 1.442695, %v3113_v14 }
 0x48d   : > { %4262 = vpow2.f32 %v3114_v61 }
 0x49a   : > { %v4263_v62 = vpop.eup %4262 }
 0x49b   : > { %v3116_v63 = vadd.f32 1.0, %v4263_v62  ;;  %v3119_v0 = vmul.f32 -0.5, %v4263_v62  ;;  %v3122_v2 = vand.u32 2147483647, %v4263_v62 }
 0x49d   : > { %4264 = vlog2.f32 %v3116_v63  ;;  %v3120_v1 = vadd.f32 1.0, %v3119_v0  ;;  %vm3123_vm3 = vcmp.lt.f32.partialorder %v3122_v2, 0.0004427343 }
 0x49f   : > { %v3121_v54 = vmul.f32 %v4263_v62, %v3120_v1 }
 0x4aa   : > { %v4265_v3 = vpop.eup %4264 }
 0x4ab   : > { %v3118_v4 = vmul.f32 0.6931472, %v4265_v3 }
 0x4ad   : > { %v3124_v6 = vsel %vm3123_vm3, %v3121_v54, %v3118_v4 }
 0x4ae   : > { %v3125_v7 = vadd.f32 %v3124_v6, %v3109_v57 }
 0x4b0   : > { %v3126_v8 = vsel %vm3110_vm4, %v3108_v11, %v3125_v7 }
 0x4b1   : > { %v3127_v10 = vadd.f32 %v3665_v56, %v3126_v8 }
 0x4b3   : > { %v3131_v13 = vsel %vm3130_vm5, %v3127_v10, %v3069_v39 }
 0x4b4   : > { %3133 = vst.msk [vmem:[%s559_s24] sm:$0xff] %vm3132_vm6, %v3131_v13 }
 0x4b5   : > { %4335 = shalt.err (!%p4332_p10)
}
 0x4b6   : > { %s4336_s3 = scalar_lea.hbm %s4985_s13, 128  ;;  %s4340_s14 = scalar_lea.hbm %s5066_s29, 256 }
 0x4b7   : > { %p4337_p1 = scmp.ne.s32.totalorder %s4985_s13, %s4336_s3  ;;  %p4341_p0 = scmp.lt.s32.totalorder %s4985_s13, %s5066_s29 }
 0x4b8   : > { %p4342_p8 = scmp.lt.s32.totalorder %s4340_s14, %s4336_s3 }
 0x4b9   : > { %p4338_p13 = pnand %p4337_p1, %p4525_p9 }
 0x4ba   : > { %p4343_p2 = por %p4342_p8, %p4341_p0 }
 0x4bb   : > { %p4339_p3 = pneg %p4338_p13 }
 0x4bd   : > { %p4344_p5 = pnand %p4343_p2, %p4339_p3 }
 0x4bf   : > { %4347 = shalt.err (!%p4344_p5)
}
 0x4c0   : > { %3722 = dma.vmem_to_hbm [thread:$0]  (%p4525_p9), %s3150_s26, 128, %s4985_s13, %s3135_s28  }
 0x4c1 PF: > { %s5067_s15 = sld [smem:[#allocation11_spill]]  ;;  %p3732_p6 = pnand %p3338_p12, %p4532_p11 }
 0x4c3   : > { %p3733_p4 = pneg %p3732_p6 }
 0x4c7   : > { %s3161_s23 = sand.u32 1, %s5067_s15  }
 0x4c8   : > { %s3162_s11 = scalar_lea.sflag [#allocation4], %s3161_s23 }
 0x4c9   : > { %4381 = dma.done.wait (%p3733_p4), %s3162_s11, 128  }
 0x4ca   : > { %4383 = vsyncadd (%p3733_p4), %s3162_s11, 4294967168  ;;  %s30_s22 = sadd.s32 1, %s4406_s22   ;;  %s5069_s27 = sld [smem:[#allocation12_spill]] }
 0x4cb   : > { %p27_p7 = scmp.ge.s32.totalorder %s30_s22, 4   ;;  %s5070_s19 = sld [smem:[#allocation15_spill]] }
 0x4cc   : > { %s5071_s12 = sld [smem:[#allocation13_spill]]  ;;  %s5072_s17 = smov %s4390_s18 }
 0x4cd   : > { %s5074_s20 = smov %s4402_s21 }
 0x4ce   :  { %29 = sbr.rel (!%p27_p7) target bundleno = 12 (0xc), region = 143 }
 0x4d0   : > { %s5073_s18 = smov %s5069_s27 }
 0x4d2   : > { %s5075_s21 = smov %s5071_s12 }
 0x4d3   :  { %3167 = vsyncpa [#allocation3], 1 }
 0x4d4   :  { %3169 = vsyncpa [#allocation3 + $0x1], 1 }
 0x4d5   :  { %3170 = vsyncpa [#allocation6], 1 }
 0x4d6   :  { %3172 = vsyncpa [#allocation6 + $0x1], 1 }
 0x4d7   :  { %3173 = vsyncpa [#allocation4], 1 }
 0x4d8   :  { %3175 = vsyncpa [#allocation4 + $0x1], 1 }

</bundles_post_ra>
